<compile_context>
chip_gen: v7x
topology: tpu7x:2x2x1
jax: 0.10.0
libtpu: 0.0.40
codegen_flags: <defaults>
</compile_context>

<pallas_src>
import jax
import jax.numpy as jnp
from jax import lax
from jax.experimental import pallas as pl
from jax.experimental.pallas import tpu as pltpu


# ----------------------------- config (small) -----------------------------
IMAGE_SIZE = 16
PATCH_SIZE = 8
NUM_CHANNELS = 3
HIDDEN = 32
NUM_HEADS = 4
HEAD_DIM = HIDDEN // NUM_HEADS
INTERMEDIATE = 64
NUM_LAYERS = 2
EPS = 1e-5
NUM_PATCHES = (IMAGE_SIZE // PATCH_SIZE) ** 2          # 4
SEQ = NUM_PATCHES + 1                                  # 5 (CLS + patches)
SCALE = HEAD_DIM ** -0.5
BATCH = 2
BS = BATCH * SEQ                                       # 10 folded rows
CPP = NUM_CHANNELS * PATCH_SIZE * PATCH_SIZE           # 192
NEG_INF = -1e30
VEC_W = 4 * HIDDEN                                     # 128 lanes per packed row
assert 3 * HIDDEN + HIDDEN <= VEC_W and INTERMEDIATE + HIDDEN <= VEC_W


# ------------------------------ fused kernel --------------------------------
def _layernorm(x, g, b):
    mu = jnp.mean(x, axis=-1, keepdims=True)
    var = jnp.mean((x - mu) ** 2, axis=-1, keepdims=True)
    return (x - mu) * lax.rsqrt(var + EPS) * g + b


def clip_fused_kernel(patches_ref, wpatch_ref, embed_ref, mask_ref, prepost_ref,
                      wqkv_ref, wo_ref, w1_ref, w2_ref, vec_ref, o_ref):
    f32 = jnp.float32
    D, Dh, I = HIDDEN, HEAD_DIM, INTERMEDIATE

    # ---- patch embedding: CLS rows are zero patch rows, embed_full carries
    #      cls_emb + positional embeddings for every folded row ----
    x = jnp.dot(patches_ref[...], wpatch_ref[...], preferred_element_type=f32)
    x = x + embed_ref[...]                                   # (BS, D)

    pp = prepost_ref[...]                                    # (1, 4D)
    x = _layernorm(x, pp[:, 0:D], pp[:, D:2 * D])            # pre_layrnorm

    # Block-diagonal mask keeps attention per-image despite folded batch rows.
    mask = mask_ref[...] > 0.5                               # (BS, BS) bool

    # ---- encoder layers (statically unrolled; all params VMEM-resident) ----
    for li in range(NUM_LAYERS):
        vec = vec_ref[li]                                    # (3, 128)
        ln1_g = vec[0:1, 0:D]
        ln1_b = vec[0:1, D:2 * D]
        ln2_g = vec[0:1, 2 * D:3 * D]
        ln2_b = vec[0:1, 3 * D:4 * D]
        bqkv = vec[1:2, 0:3 * D]
        bout = vec[1:2, 3 * D:4 * D]
        b1 = vec[2:3, 0:I]
        b2 = vec[2:3, I:I + D]

        # --- self-attention (CLIPAttention) ---
        h = _layernorm(x, ln1_g, ln1_b)
        # one fused QKV matmul per layer
        qkv = jnp.dot(h, wqkv_ref[li], preferred_element_type=f32) + bqkv  # (BS, 3D)

        heads = []
        for hi in range(NUM_HEADS):
            q = qkv[:, hi * Dh:(hi + 1) * Dh]                # static lane slices
            k = qkv[:, D + hi * Dh:D + (hi + 1) * Dh]
            v = qkv[:, 2 * D + hi * Dh:2 * D + (hi + 1) * Dh]

            s = lax.dot_general(q, k, (((1,), (1,)), ((), ())),
                                preferred_element_type=f32) * SCALE
            s = jnp.where(mask, s, NEG_INF)
            s = s - jnp.max(s, axis=-1, keepdims=True)
            p = jnp.exp(s)
            p = p * pl.reciprocal(jnp.sum(p, axis=-1, keepdims=True), approx=True)
            heads.append(jnp.dot(p, v, preferred_element_type=f32))  # (BS, Dh)

        attn = jnp.concatenate(heads, axis=-1)               # (BS, D) lane-concat
        x = x + jnp.dot(attn, wo_ref[li], preferred_element_type=f32) + bout

        # --- MLP (quick_gelu) ---
        hm = _layernorm(x, ln2_g, ln2_b)
        m = jnp.dot(hm, w1_ref[li], preferred_element_type=f32) + b1
        m = m * jax.nn.sigmoid(1.702 * m)
        x = x + jnp.dot(m, w2_ref[li], preferred_element_type=f32) + b2

    # ---- post_layernorm ----
    x = _layernorm(x, pp[:, 2 * D:3 * D], pp[:, 3 * D:4 * D])
    o_ref[...] = x                                           # (BS, D)


# ------------------------------ wrapper --------------------------------------
def _vmem_spec():
    return pl.BlockSpec(memory_space=pltpu.MemorySpace.VMEM)


def pack_params(params):
    """One-time, off-hot-path repacking of parameters into lane-dense arrays."""
    D, I = HIDDEN, INTERMEDIATE
    f32 = jnp.float32

    wpatch = params["conv_w"].reshape(D, CPP).T                         # (CPP, D)

    pos = params["pos_emb"]                                             # (S, D)
    cls = params["cls_emb"].reshape(1, D)
    emb_img = jnp.concatenate([cls + pos[0:1], pos[1:]], axis=0)        # (S, D)
    embed_full = jnp.tile(emb_img, (BATCH, 1))                          # (BS, D)

    bidx = jnp.arange(BS) // SEQ
    mask = (bidx[:, None] == bidx[None, :]).astype(f32)                 # (BS, BS)

    prepost = jnp.concatenate(
        [params["pre_ln_g"], params["pre_ln_b"],
         params["post_ln_g"], params["post_ln_b"]]).reshape(1, 4 * D)   # (1, 128)

    wqkv, wo, w1, w2, vecs = [], [], [], [], []
    for lp in params["layers"]:
        wqkv.append(lp["wqkv"])                                         # (D, 3D)
        wo.append(lp["wout"])                                           # (D, D)
        w1.append(lp["w1"])                                             # (D, I)
        w2.append(lp["w2"])                                             # (I, D)
        row0 = jnp.concatenate([lp["ln1_g"], lp["ln1_b"],
                                lp["ln2_g"], lp["ln2_b"]])              # 4D = 128
        row1 = jnp.concatenate([lp["bqkv"], lp["bout"]])                # 3D + D
        row2 = jnp.concatenate([lp["b1"], lp["b2"],
                                jnp.zeros((VEC_W - I - D,), f32)])      # I + D + pad
        vecs.append(jnp.stack([row0, row1, row2], axis=0))              # (3, 128)

    return {
        "wpatch": wpatch,
        "embed_full": embed_full,
        "mask": mask,
        "prepost": prepost,
        "wqkv": jnp.stack(wqkv, axis=0),     # (L, D, 3D)
        "wo": jnp.stack(wo, axis=0),         # (L, D, D)
        "w1": jnp.stack(w1, axis=0),         # (L, D, I)
        "w2": jnp.stack(w2, axis=0),         # (L, I, D)
        "vecs": jnp.stack(vecs, axis=0),     # (L, 3, 128)
    }


@jax.jit
def clip_vision_forward(pixel_values, packed):
    B, C, H, W = pixel_values.shape
    P = PATCH_SIZE
    Hp, Wp = H // P, W // P
    N = Hp * Wp
    D = HIDDEN

    # ---- per-call glue: patch extraction; zero rows at CLS positions ----
    x = pixel_values.reshape(B, C, Hp, P, Wp, P)
    x = jnp.transpose(x, (0, 2, 4, 1, 3, 5)).reshape(B, N, C * P * P)
    patches = jnp.concatenate(
        [jnp.zeros((B, 1, C * P * P), x.dtype), x], axis=1).reshape(B * SEQ, C * P * P)

    # Single fused, gridless pallas_call: everything lives in VMEM (<1 MiB).
    out_flat = pl.pallas_call(
        clip_fused_kernel,
        out_shape=jax.ShapeDtypeStruct((B * SEQ, D), jnp.float32),
        in_specs=[_vmem_spec()] * 10,
        out_specs=_vmem_spec(),
    )(patches, packed["wpatch"], packed["embed_full"], packed["mask"],
      packed["prepost"], packed["wqkv"], packed["wo"], packed["w1"],
      packed["w2"], packed["vecs"])

    return out_flat.reshape(B, SEQ, D)


# ------------------------------ pure-JAX reference ---------------------------
def clip_vision_model_ref(pixel_values, params):
    B, C, H, W = pixel_values.shape
    P = PATCH_SIZE
    Hp, Wp = H // P, W // P
    N = Hp * Wp
    D = HIDDEN

    x = pixel_values.reshape(B, C, Hp, P, Wp, P)
    x = jnp.transpose(x, (0, 2, 4, 1, 3, 5)).reshape(B, N, C * P * P)
    pe = x @ params["conv_w"].reshape(D, C * P * P).T
    cls = jnp.broadcast_to(params["cls_emb"].reshape(1, 1, D), (B, 1, D))
    h = jnp.concatenate([cls, pe], axis=1) + params["pos_emb"][None]

    def ln(v, g, b):
        mu = v.mean(-1, keepdims=True)
        var = ((v - mu) ** 2).mean(-1, keepdims=True)
        return (v - mu) * lax.rsqrt(var + EPS) * g + b

    h = ln(h, params["pre_ln_g"], params["pre_ln_b"])
    for lp in params["layers"]:
        r = h
        y = ln(h, lp["ln1_g"], lp["ln1_b"])
        qkv = y @ lp["wqkv"] + lp["bqkv"]
        q, k, v = jnp.split(qkv, 3, axis=-1)
        q = q.reshape(B, SEQ, NUM_HEADS, HEAD_DIM).transpose(0, 2, 1, 3)
        k = k.reshape(B, SEQ, NUM_HEADS, HEAD_DIM).transpose(0, 2, 1, 3)
        v = v.reshape(B, SEQ, NUM_HEADS, HEAD_DIM).transpose(0, 2, 1, 3)
        s = jnp.einsum('bhqd,bhkd->bhqk', q, k) * SCALE
        p = jax.nn.softmax(s, axis=-1)
        o = jnp.einsum('bhqk,bhkd->bhqd', p, v).transpose(0, 2, 1, 3).reshape(B, SEQ, D)
        h = r + o @ lp["wout"] + lp["bout"]
        r = h
        y = ln(h, lp["ln2_g"], lp["ln2_b"])
        m = y @ lp["w1"] + lp["b1"]
        m = m * jax.nn.sigmoid(1.702 * m)
        h = r + m @ lp["w2"] + lp["b2"]
    return ln(h, params["post_ln_g"], params["post_ln_b"])


# ------------------------------ params ---------------------------------------
def init_params(key):
    def nrm(key, shape, scale=0.02):
        return jax.random.normal(key, shape, dtype=jnp.float32) * scale

    keys = jax.random.split(key, 8 + NUM_LAYERS)
    params = {
        "conv_w": nrm(keys[0], (HIDDEN, NUM_CHANNELS, PATCH_SIZE, PATCH_SIZE)),
        "cls_emb": nrm(keys[1], (HIDDEN,)),
        "pos_emb": nrm(keys[2], (SEQ, HIDDEN)),
        "pre_ln_g": jnp.ones((HIDDEN,), jnp.float32),
        "pre_ln_b": jnp.zeros((HIDDEN,), jnp.float32),
        "post_ln_g": jnp.ones((HIDDEN,), jnp.float32),
        "post_ln_b": jnp.zeros((HIDDEN,), jnp.float32),
        "layers": [],
    }
    for li in range(NUM_LAYERS):
        k = jax.random.split(keys[8 + li], 8)
        params["layers"].append({
            "ln1_g": jnp.ones((HIDDEN,), jnp.float32),
            "ln1_b": jnp.zeros((HIDDEN,), jnp.float32),
            "wqkv": nrm(k[0], (HIDDEN, 3 * HIDDEN)),    # (in, out) layout
            "bqkv": nrm(k[1], (3 * HIDDEN,)),
            "wout": nrm(k[2], (HIDDEN, HIDDEN)),
            "bout": nrm(k[3], (HIDDEN,)),
            "ln2_g": jnp.ones((HIDDEN,), jnp.float32),
            "ln2_b": jnp.zeros((HIDDEN,), jnp.float32),
            "w1": nrm(k[4], (HIDDEN, INTERMEDIATE)),
            "b1": nrm(k[5], (INTERMEDIATE,)),
            "w2": nrm(k[6], (INTERMEDIATE, HIDDEN)),
            "b2": nrm(k[7], (HIDDEN,)),
        })
    return params


# ------------------------------ main ------------------------------------------
if __name__ == "__main__":
    key = jax.random.PRNGKey(0)
    k_param, k_input = jax.random.split(key)
    params = init_params(k_param)
    packed = pack_params(params)          # one-time repacking, off the hot path

    # pixel_values: NCHW, [B=2, C=3, H=16, W=16]
    pixel_values = jax.random.normal(
        k_input, (BATCH, NUM_CHANNELS, IMAGE_SIZE, IMAGE_SIZE), dtype=jnp.float32)

    out = clip_vision_forward(pixel_values, packed)
    out = jax.block_until_ready(out)

    assert out.shape == (BATCH, SEQ, HIDDEN), out.shape
    assert bool(jnp.all(jnp.isfinite(out)))

    ref = clip_vision_model_ref(pixel_values, params)
    max_err = float(jnp.max(jnp.abs(out - ref)))
    assert max_err < 5e-2, f"mismatch vs reference: {max_err}"

    print("KERNEL_OK")
</pallas_src>

<mosaic_0001>
module attributes {stable_mosaic.version = 11 : i64} {
  func.func @clip_fused_kernel(%arg0: memref<10x192xf32, #tpu.memory_space<vmem>>, %arg1: memref<192x32xf32, #tpu.memory_space<vmem>>, %arg2: memref<10x32xf32, #tpu.memory_space<vmem>>, %arg3: memref<10x10xf32, #tpu.memory_space<vmem>>, %arg4: memref<1x128xf32, #tpu.memory_space<vmem>>, %arg5: memref<2x32x96xf32, #tpu.memory_space<vmem>>, %arg6: memref<2x32x32xf32, #tpu.memory_space<vmem>>, %arg7: memref<2x32x64xf32, #tpu.memory_space<vmem>>, %arg8: memref<2x64x32xf32, #tpu.memory_space<vmem>>, %arg9: memref<2x3x128xf32, #tpu.memory_space<vmem>>, %arg10: memref<10x32xf32, #tpu.memory_space<vmem>>) attributes {dimension_semantics = [], scalar_prefetch = 0 : i64, scratch_operands = 0 : i64, tpu.core_type = #tpu.core_type<tc>} {
    %c0 = arith.constant 0 : index
    %c0_0 = arith.constant 0 : index
    %0 = vector.load %arg0[%c0, %c0_0] : memref<10x192xf32, #tpu.memory_space<vmem>>, vector<10x192xf32>
    %c0_1 = arith.constant 0 : index
    %c0_2 = arith.constant 0 : index
    %1 = vector.load %arg1[%c0_1, %c0_2] : memref<192x32xf32, #tpu.memory_space<vmem>>, vector<192x32xf32>
    %cst = arith.constant dense<0.000000e+00> : vector<10x32xf32>
    %2 = tpu.matmul %0, %1, %cst {dimension_numbers = #tpu.dot_dimension_numbers<[1], [0], [0], [1], [0, 0, 1, 1], [], []>} : vector<10x192xf32>, vector<192x32xf32>, vector<10x32xf32> -> vector<10x32xf32>
    %c0_3 = arith.constant 0 : index
    %c0_4 = arith.constant 0 : index
    %3 = vector.load %arg2[%c0_3, %c0_4] : memref<10x32xf32, #tpu.memory_space<vmem>>, vector<10x32xf32>
    %4 = arith.addf %2, %3 : vector<10x32xf32>
    %c0_5 = arith.constant 0 : index
    %c0_6 = arith.constant 0 : index
    %5 = vector.load %arg4[%c0_5, %c0_6] : memref<1x128xf32, #tpu.memory_space<vmem>>, vector<1x128xf32>
    %6 = vector.extract_strided_slice %5 {offsets = [0, 0], sizes = [1, 32], strides = [1, 1]} : vector<1x128xf32> to vector<1x32xf32>
    %7 = vector.extract_strided_slice %5 {offsets = [0, 32], sizes = [1, 32], strides = [1, 1]} : vector<1x128xf32> to vector<1x32xf32>
    %cst_7 = arith.constant dense<0.000000e+00> : vector<10xf32>
    %8 = vector.multi_reduction <add>, %4, %cst_7 [1] : vector<10x32xf32> to vector<10xf32>
    %9 = vector.shape_cast %8 : vector<10xf32> to vector<10x1xf32>
    %cst_8 = arith.constant 3.200000e+01 : f32
    %10 = vector.broadcast %cst_8 : f32 to vector<10x1xf32>
    %11 = arith.divf %9, %10 : vector<10x1xf32>
    %12 = vector.broadcast %11 : vector<10x1xf32> to vector<10x32xf32>
    %13 = arith.subf %4, %12 : vector<10x32xf32>
    %14 = arith.mulf %13, %13 : vector<10x32xf32>
    %cst_9 = arith.constant dense<0.000000e+00> : vector<10xf32>
    %15 = vector.multi_reduction <add>, %14, %cst_9 [1] : vector<10x32xf32> to vector<10xf32>
    %16 = vector.shape_cast %15 : vector<10xf32> to vector<10x1xf32>
    %cst_10 = arith.constant 3.200000e+01 : f32
    %17 = vector.broadcast %cst_10 : f32 to vector<10x1xf32>
    %18 = arith.divf %16, %17 : vector<10x1xf32>
    %19 = vector.broadcast %11 : vector<10x1xf32> to vector<10x32xf32>
    %20 = arith.subf %4, %19 : vector<10x32xf32>
    %cst_11 = arith.constant 9.99999974E-6 : f32
    %21 = vector.broadcast %cst_11 : f32 to vector<10x1xf32>
    %22 = arith.addf %18, %21 : vector<10x1xf32>
    %23 = math.rsqrt %22 : vector<10x1xf32>
    %24 = vector.broadcast %23 : vector<10x1xf32> to vector<10x32xf32>
    %25 = arith.mulf %20, %24 : vector<10x32xf32>
    %26 = vector.broadcast %6 : vector<1x32xf32> to vector<10x32xf32>
    %27 = arith.mulf %25, %26 : vector<10x32xf32>
    %28 = vector.broadcast %7 : vector<1x32xf32> to vector<10x32xf32>
    %29 = arith.addf %27, %28 : vector<10x32xf32>
    %c0_12 = arith.constant 0 : index
    %c0_13 = arith.constant 0 : index
    %30 = vector.load %arg3[%c0_12, %c0_13] : memref<10x10xf32, #tpu.memory_space<vmem>>, vector<10x10xf32>
    %cst_14 = arith.constant 5.000000e-01 : f32
    %31 = vector.broadcast %cst_14 : f32 to vector<10x10xf32>
    %32 = arith.cmpf ogt, %30, %31 : vector<10x10xf32>
    %c0_15 = arith.constant 0 : index
    %c0_16 = arith.constant 0 : index
    %c0_17 = arith.constant 0 : index
    %33 = vector.load %arg9[%c0_15, %c0_16, %c0_17] : memref<2x3x128xf32, #tpu.memory_space<vmem>>, vector<1x3x128xf32>
    %34 = vector.shape_cast %33 : vector<1x3x128xf32> to vector<3x128xf32>
    %35 = vector.extract_strided_slice %34 {offsets = [0, 0], sizes = [1, 32], strides = [1, 1]} : vector<3x128xf32> to vector<1x32xf32>
    %36 = vector.extract_strided_slice %34 {offsets = [0, 32], sizes = [1, 32], strides = [1, 1]} : vector<3x128xf32> to vector<1x32xf32>
    %37 = vector.extract_strided_slice %34 {offsets = [0, 64], sizes = [1, 32], strides = [1, 1]} : vector<3x128xf32> to vector<1x32xf32>
    %38 = vector.extract_strided_slice %34 {offsets = [0, 96], sizes = [1, 32], strides = [1, 1]} : vector<3x128xf32> to vector<1x32xf32>
    %39 = vector.extract_strided_slice %34 {offsets = [1, 0], sizes = [1, 96], strides = [1, 1]} : vector<3x128xf32> to vector<1x96xf32>
    %40 = vector.extract_strided_slice %34 {offsets = [1, 96], sizes = [1, 32], strides = [1, 1]} : vector<3x128xf32> to vector<1x32xf32>
    %41 = vector.extract_strided_slice %34 {offsets = [2, 0], sizes = [1, 64], strides = [1, 1]} : vector<3x128xf32> to vector<1x64xf32>
    %42 = vector.extract_strided_slice %34 {offsets = [2, 64], sizes = [1, 32], strides = [1, 1]} : vector<3x128xf32> to vector<1x32xf32>
    %cst_18 = arith.constant dense<0.000000e+00> : vector<10xf32>
    %43 = vector.multi_reduction <add>, %29, %cst_18 [1] : vector<10x32xf32> to vector<10xf32>
    %44 = vector.shape_cast %43 : vector<10xf32> to vector<10x1xf32>
    %cst_19 = arith.constant 3.200000e+01 : f32
    %45 = vector.broadcast %cst_19 : f32 to vector<10x1xf32>
    %46 = arith.divf %44, %45 : vector<10x1xf32>
    %47 = vector.broadcast %46 : vector<10x1xf32> to vector<10x32xf32>
    %48 = arith.subf %29, %47 : vector<10x32xf32>
    %49 = arith.mulf %48, %48 : vector<10x32xf32>
    %cst_20 = arith.constant dense<0.000000e+00> : vector<10xf32>
    %50 = vector.multi_reduction <add>, %49, %cst_20 [1] : vector<10x32xf32> to vector<10xf32>
    %51 = vector.shape_cast %50 : vector<10xf32> to vector<10x1xf32>
    %cst_21 = arith.constant 3.200000e+01 : f32
    %52 = vector.broadcast %cst_21 : f32 to vector<10x1xf32>
    %53 = arith.divf %51, %52 : vector<10x1xf32>
    %54 = vector.broadcast %46 : vector<10x1xf32> to vector<10x32xf32>
    %55 = arith.subf %29, %54 : vector<10x32xf32>
    %cst_22 = arith.constant 9.99999974E-6 : f32
    %56 = vector.broadcast %cst_22 : f32 to vector<10x1xf32>
    %57 = arith.addf %53, %56 : vector<10x1xf32>
    %58 = math.rsqrt %57 : vector<10x1xf32>
    %59 = vector.broadcast %58 : vector<10x1xf32> to vector<10x32xf32>
    %60 = arith.mulf %55, %59 : vector<10x32xf32>
    %61 = vector.broadcast %35 : vector<1x32xf32> to vector<10x32xf32>
    %62 = arith.mulf %60, %61 : vector<10x32xf32>
    %63 = vector.broadcast %36 : vector<1x32xf32> to vector<10x32xf32>
    %64 = arith.addf %62, %63 : vector<10x32xf32>
    %c0_23 = arith.constant 0 : index
    %c0_24 = arith.constant 0 : index
    %c0_25 = arith.constant 0 : index
    %65 = vector.load %arg5[%c0_23, %c0_24, %c0_25] : memref<2x32x96xf32, #tpu.memory_space<vmem>>, vector<1x32x96xf32>
    %66 = vector.shape_cast %65 : vector<1x32x96xf32> to vector<32x96xf32>
    %cst_26 = arith.constant dense<0.000000e+00> : vector<10x96xf32>
    %67 = tpu.matmul %64, %66, %cst_26 {dimension_numbers = #tpu.dot_dimension_numbers<[1], [0], [0], [1], [0, 0, 1, 1], [], []>} : vector<10x32xf32>, vector<32x96xf32>, vector<10x96xf32> -> vector<10x96xf32>
    %68 = vector.broadcast %39 : vector<1x96xf32> to vector<10x96xf32>
    %69 = arith.addf %67, %68 : vector<10x96xf32>
    %70 = vector.extract_strided_slice %69 {offsets = [0, 0], sizes = [10, 8], strides = [1, 1]} : vector<10x96xf32> to vector<10x8xf32>
    %71 = vector.extract_strided_slice %69 {offsets = [0, 32], sizes = [10, 8], strides = [1, 1]} : vector<10x96xf32> to vector<10x8xf32>
    %72 = vector.extract_strided_slice %69 {offsets = [0, 64], sizes = [10, 8], strides = [1, 1]} : vector<10x96xf32> to vector<10x8xf32>
    %cst_27 = arith.constant dense<0.000000e+00> : vector<10x10xf32>
    %73 = tpu.matmul %70, %71, %cst_27 {dimension_numbers = #tpu.dot_dimension_numbers<[1], [1], [0], [0], [0, 0, 1, 0], [], []>} : vector<10x8xf32>, vector<10x8xf32>, vector<10x10xf32> -> vector<10x10xf32>
    %cst_28 = arith.constant 0.353553385 : f32
    %74 = vector.broadcast %cst_28 : f32 to vector<10x10xf32>
    %75 = arith.mulf %73, %74 : vector<10x10xf32>
    %cst_29 = arith.constant -1.000000e+30 : f32
    %76 = vector.broadcast %cst_29 : f32 to vector<10x10xf32>
    %77 = arith.select %32, %75, %76 : vector<10x10xi1>, vector<10x10xf32>
    %cst_30 = arith.constant dense<0xFF800000> : vector<10xf32>
    %78 = vector.multi_reduction <maximumf>, %77, %cst_30 [1] : vector<10x10xf32> to vector<10xf32>
    %79 = vector.shape_cast %78 : vector<10xf32> to vector<10x1xf32>
    %80 = vector.broadcast %79 : vector<10x1xf32> to vector<10x10xf32>
    %81 = arith.subf %77, %80 : vector<10x10xf32>
    %82 = math.exp %81 : vector<10x10xf32>
    %cst_31 = arith.constant dense<0.000000e+00> : vector<10xf32>
    %83 = vector.multi_reduction <add>, %82, %cst_31 [1] : vector<10x10xf32> to vector<10xf32>
    %84 = vector.shape_cast %83 : vector<10xf32> to vector<10x1xf32>
    %85 = tpu.reciprocal %84 {approx = true} : vector<10x1xf32> -> vector<10x1xf32>
    %86 = vector.broadcast %85 : vector<10x1xf32> to vector<10x10xf32>
    %87 = arith.mulf %82, %86 : vector<10x10xf32>
    %cst_32 = arith.constant dense<0.000000e+00> : vector<10x8xf32>
    %88 = tpu.matmul %87, %72, %cst_32 {dimension_numbers = #tpu.dot_dimension_numbers<[1], [0], [0], [1], [0, 0, 1, 1], [], []>} : vector<10x10xf32>, vector<10x8xf32>, vector<10x8xf32> -> vector<10x8xf32>
    %89 = vector.extract_strided_slice %69 {offsets = [0, 8], sizes = [10, 8], strides = [1, 1]} : vector<10x96xf32> to vector<10x8xf32>
    %90 = vector.extract_strided_slice %69 {offsets = [0, 40], sizes = [10, 8], strides = [1, 1]} : vector<10x96xf32> to vector<10x8xf32>
    %91 = vector.extract_strided_slice %69 {offsets = [0, 72], sizes = [10, 8], strides = [1, 1]} : vector<10x96xf32> to vector<10x8xf32>
    %cst_33 = arith.constant dense<0.000000e+00> : vector<10x10xf32>
    %92 = tpu.matmul %89, %90, %cst_33 {dimension_numbers = #tpu.dot_dimension_numbers<[1], [1], [0], [0], [0, 0, 1, 0], [], []>} : vector<10x8xf32>, vector<10x8xf32>, vector<10x10xf32> -> vector<10x10xf32>
    %cst_34 = arith.constant 0.353553385 : f32
    %93 = vector.broadcast %cst_34 : f32 to vector<10x10xf32>
    %94 = arith.mulf %92, %93 : vector<10x10xf32>
    %cst_35 = arith.constant -1.000000e+30 : f32
    %95 = vector.broadcast %cst_35 : f32 to vector<10x10xf32>
    %96 = arith.select %32, %94, %95 : vector<10x10xi1>, vector<10x10xf32>
    %cst_36 = arith.constant dense<0xFF800000> : vector<10xf32>
    %97 = vector.multi_reduction <maximumf>, %96, %cst_36 [1] : vector<10x10xf32> to vector<10xf32>
    %98 = vector.shape_cast %97 : vector<10xf32> to vector<10x1xf32>
    %99 = vector.broadcast %98 : vector<10x1xf32> to vector<10x10xf32>
    %100 = arith.subf %96, %99 : vector<10x10xf32>
    %101 = math.exp %100 : vector<10x10xf32>
    %cst_37 = arith.constant dense<0.000000e+00> : vector<10xf32>
    %102 = vector.multi_reduction <add>, %101, %cst_37 [1] : vector<10x10xf32> to vector<10xf32>
    %103 = vector.shape_cast %102 : vector<10xf32> to vector<10x1xf32>
    %104 = tpu.reciprocal %103 {approx = true} : vector<10x1xf32> -> vector<10x1xf32>
    %105 = vector.broadcast %104 : vector<10x1xf32> to vector<10x10xf32>
    %106 = arith.mulf %101, %105 : vector<10x10xf32>
    %cst_38 = arith.constant dense<0.000000e+00> : vector<10x8xf32>
    %107 = tpu.matmul %106, %91, %cst_38 {dimension_numbers = #tpu.dot_dimension_numbers<[1], [0], [0], [1], [0, 0, 1, 1], [], []>} : vector<10x10xf32>, vector<10x8xf32>, vector<10x8xf32> -> vector<10x8xf32>
    %108 = vector.extract_strided_slice %69 {offsets = [0, 16], sizes = [10, 8], strides = [1, 1]} : vector<10x96xf32> to vector<10x8xf32>
    %109 = vector.extract_strided_slice %69 {offsets = [0, 48], sizes = [10, 8], strides = [1, 1]} : vector<10x96xf32> to vector<10x8xf32>
    %110 = vector.extract_strided_slice %69 {offsets = [0, 80], sizes = [10, 8], strides = [1, 1]} : vector<10x96xf32> to vector<10x8xf32>
    %cst_39 = arith.constant dense<0.000000e+00> : vector<10x10xf32>
    %111 = tpu.matmul %108, %109, %cst_39 {dimension_numbers = #tpu.dot_dimension_numbers<[1], [1], [0], [0], [0, 0, 1, 0], [], []>} : vector<10x8xf32>, vector<10x8xf32>, vector<10x10xf32> -> vector<10x10xf32>
    %cst_40 = arith.constant 0.353553385 : f32
    %112 = vector.broadcast %cst_40 : f32 to vector<10x10xf32>
    %113 = arith.mulf %111, %112 : vector<10x10xf32>
    %cst_41 = arith.constant -1.000000e+30 : f32
    %114 = vector.broadcast %cst_41 : f32 to vector<10x10xf32>
    %115 = arith.select %32, %113, %114 : vector<10x10xi1>, vector<10x10xf32>
    %cst_42 = arith.constant dense<0xFF800000> : vector<10xf32>
    %116 = vector.multi_reduction <maximumf>, %115, %cst_42 [1] : vector<10x10xf32> to vector<10xf32>
    %117 = vector.shape_cast %116 : vector<10xf32> to vector<10x1xf32>
    %118 = vector.broadcast %117 : vector<10x1xf32> to vector<10x10xf32>
    %119 = arith.subf %115, %118 : vector<10x10xf32>
    %120 = math.exp %119 : vector<10x10xf32>
    %cst_43 = arith.constant dense<0.000000e+00> : vector<10xf32>
    %121 = vector.multi_reduction <add>, %120, %cst_43 [1] : vector<10x10xf32> to vector<10xf32>
    %122 = vector.shape_cast %121 : vector<10xf32> to vector<10x1xf32>
    %123 = tpu.reciprocal %122 {approx = true} : vector<10x1xf32> -> vector<10x1xf32>
    %124 = vector.broadcast %123 : vector<10x1xf32> to vector<10x10xf32>
    %125 = arith.mulf %120, %124 : vector<10x10xf32>
    %cst_44 = arith.constant dense<0.000000e+00> : vector<10x8xf32>
    %126 = tpu.matmul %125, %110, %cst_44 {dimension_numbers = #tpu.dot_dimension_numbers<[1], [0], [0], [1], [0, 0, 1, 1], [], []>} : vector<10x10xf32>, vector<10x8xf32>, vector<10x8xf32> -> vector<10x8xf32>
    %127 = vector.extract_strided_slice %69 {offsets = [0, 24], sizes = [10, 8], strides = [1, 1]} : vector<10x96xf32> to vector<10x8xf32>
    %128 = vector.extract_strided_slice %69 {offsets = [0, 56], sizes = [10, 8], strides = [1, 1]} : vector<10x96xf32> to vector<10x8xf32>
    %129 = vector.extract_strided_slice %69 {offsets = [0, 88], sizes = [10, 8], strides = [1, 1]} : vector<10x96xf32> to vector<10x8xf32>
    %cst_45 = arith.constant dense<0.000000e+00> : vector<10x10xf32>
    %130 = tpu.matmul %127, %128, %cst_45 {dimension_numbers = #tpu.dot_dimension_numbers<[1], [1], [0], [0], [0, 0, 1, 0], [], []>} : vector<10x8xf32>, vector<10x8xf32>, vector<10x10xf32> -> vector<10x10xf32>
    %cst_46 = arith.constant 0.353553385 : f32
    %131 = vector.broadcast %cst_46 : f32 to vector<10x10xf32>
    %132 = arith.mulf %130, %131 : vector<10x10xf32>
    %cst_47 = arith.constant -1.000000e+30 : f32
    %133 = vector.broadcast %cst_47 : f32 to vector<10x10xf32>
    %134 = arith.select %32, %132, %133 : vector<10x10xi1>, vector<10x10xf32>
    %cst_48 = arith.constant dense<0xFF800000> : vector<10xf32>
    %135 = vector.multi_reduction <maximumf>, %134, %cst_48 [1] : vector<10x10xf32> to vector<10xf32>
    %136 = vector.shape_cast %135 : vector<10xf32> to vector<10x1xf32>
    %137 = vector.broadcast %136 : vector<10x1xf32> to vector<10x10xf32>
    %138 = arith.subf %134, %137 : vector<10x10xf32>
    %139 = math.exp %138 : vector<10x10xf32>
    %cst_49 = arith.constant dense<0.000000e+00> : vector<10xf32>
    %140 = vector.multi_reduction <add>, %139, %cst_49 [1] : vector<10x10xf32> to vector<10xf32>
    %141 = vector.shape_cast %140 : vector<10xf32> to vector<10x1xf32>
    %142 = tpu.reciprocal %141 {approx = true} : vector<10x1xf32> -> vector<10x1xf32>
    %143 = vector.broadcast %142 : vector<10x1xf32> to vector<10x10xf32>
    %144 = arith.mulf %139, %143 : vector<10x10xf32>
    %cst_50 = arith.constant dense<0.000000e+00> : vector<10x8xf32>
    %145 = tpu.matmul %144, %129, %cst_50 {dimension_numbers = #tpu.dot_dimension_numbers<[1], [0], [0], [1], [0, 0, 1, 1], [], []>} : vector<10x10xf32>, vector<10x8xf32>, vector<10x8xf32> -> vector<10x8xf32>
    %146 = tpu.concatenate %88, %107, %126, %145 in 1 : vector<10x8xf32>, vector<10x8xf32>, vector<10x8xf32>, vector<10x8xf32> -> vector<10x32xf32>
    %c0_51 = arith.constant 0 : index
    %c0_52 = arith.constant 0 : index
    %c0_53 = arith.constant 0 : index
    %147 = vector.load %arg6[%c0_51, %c0_52, %c0_53] : memref<2x32x32xf32, #tpu.memory_space<vmem>>, vector<1x32x32xf32>
    %148 = vector.shape_cast %147 : vector<1x32x32xf32> to vector<32x32xf32>
    %cst_54 = arith.constant dense<0.000000e+00> : vector<10x32xf32>
    %149 = tpu.matmul %146, %148, %cst_54 {dimension_numbers = #tpu.dot_dimension_numbers<[1], [0], [0], [1], [0, 0, 1, 1], [], []>} : vector<10x32xf32>, vector<32x32xf32>, vector<10x32xf32> -> vector<10x32xf32>
    %150 = arith.addf %29, %149 : vector<10x32xf32>
    %151 = vector.broadcast %40 : vector<1x32xf32> to vector<10x32xf32>
    %152 = arith.addf %150, %151 : vector<10x32xf32>
    %cst_55 = arith.constant dense<0.000000e+00> : vector<10xf32>
    %153 = vector.multi_reduction <add>, %152, %cst_55 [1] : vector<10x32xf32> to vector<10xf32>
    %154 = vector.shape_cast %153 : vector<10xf32> to vector<10x1xf32>
    %cst_56 = arith.constant 3.200000e+01 : f32
    %155 = vector.broadcast %cst_56 : f32 to vector<10x1xf32>
    %156 = arith.divf %154, %155 : vector<10x1xf32>
    %157 = vector.broadcast %156 : vector<10x1xf32> to vector<10x32xf32>
    %158 = arith.subf %152, %157 : vector<10x32xf32>
    %159 = arith.mulf %158, %158 : vector<10x32xf32>
    %cst_57 = arith.constant dense<0.000000e+00> : vector<10xf32>
    %160 = vector.multi_reduction <add>, %159, %cst_57 [1] : vector<10x32xf32> to vector<10xf32>
    %161 = vector.shape_cast %160 : vector<10xf32> to vector<10x1xf32>
    %cst_58 = arith.constant 3.200000e+01 : f32
    %162 = vector.broadcast %cst_58 : f32 to vector<10x1xf32>
    %163 = arith.divf %161, %162 : vector<10x1xf32>
    %164 = vector.broadcast %156 : vector<10x1xf32> to vector<10x32xf32>
    %165 = arith.subf %152, %164 : vector<10x32xf32>
    %cst_59 = arith.constant 9.99999974E-6 : f32
    %166 = vector.broadcast %cst_59 : f32 to vector<10x1xf32>
    %167 = arith.addf %163, %166 : vector<10x1xf32>
    %168 = math.rsqrt %167 : vector<10x1xf32>
    %169 = vector.broadcast %168 : vector<10x1xf32> to vector<10x32xf32>
    %170 = arith.mulf %165, %169 : vector<10x32xf32>
    %171 = vector.broadcast %37 : vector<1x32xf32> to vector<10x32xf32>
    %172 = arith.mulf %170, %171 : vector<10x32xf32>
    %173 = vector.broadcast %38 : vector<1x32xf32> to vector<10x32xf32>
    %174 = arith.addf %172, %173 : vector<10x32xf32>
    %c0_60 = arith.constant 0 : index
    %c0_61 = arith.constant 0 : index
    %c0_62 = arith.constant 0 : index
    %175 = vector.load %arg7[%c0_60, %c0_61, %c0_62] : memref<2x32x64xf32, #tpu.memory_space<vmem>>, vector<1x32x64xf32>
    %176 = vector.shape_cast %175 : vector<1x32x64xf32> to vector<32x64xf32>
    %cst_63 = arith.constant dense<0.000000e+00> : vector<10x64xf32>
    %177 = tpu.matmul %174, %176, %cst_63 {dimension_numbers = #tpu.dot_dimension_numbers<[1], [0], [0], [1], [0, 0, 1, 1], [], []>} : vector<10x32xf32>, vector<32x64xf32>, vector<10x64xf32> -> vector<10x64xf32>
    %178 = vector.broadcast %41 : vector<1x64xf32> to vector<10x64xf32>
    %179 = arith.addf %177, %178 : vector<10x64xf32>
    %cst_64 = arith.constant 1.702000e+00 : f32
    %180 = vector.broadcast %cst_64 : f32 to vector<10x64xf32>
    %181 = arith.mulf %180, %179 : vector<10x64xf32>
    %182 = arith.negf %181 : vector<10x64xf32>
    %183 = math.exp %182 : vector<10x64xf32>
    %cst_65 = arith.constant 1.000000e+00 : f32
    %184 = vector.broadcast %cst_65 : f32 to vector<10x64xf32>
    %185 = arith.addf %184, %183 : vector<10x64xf32>
    %186 = arith.divf %184, %185 : vector<10x64xf32>
    %187 = arith.mulf %179, %186 : vector<10x64xf32>
    %c0_66 = arith.constant 0 : index
    %c0_67 = arith.constant 0 : index
    %c0_68 = arith.constant 0 : index
    %188 = vector.load %arg8[%c0_66, %c0_67, %c0_68] : memref<2x64x32xf32, #tpu.memory_space<vmem>>, vector<1x64x32xf32>
    %189 = vector.shape_cast %188 : vector<1x64x32xf32> to vector<64x32xf32>
    %cst_69 = arith.constant dense<0.000000e+00> : vector<10x32xf32>
    %190 = tpu.matmul %187, %189, %cst_69 {dimension_numbers = #tpu.dot_dimension_numbers<[1], [0], [0], [1], [0, 0, 1, 1], [], []>} : vector<10x64xf32>, vector<64x32xf32>, vector<10x32xf32> -> vector<10x32xf32>
    %191 = arith.addf %152, %190 : vector<10x32xf32>
    %192 = vector.broadcast %42 : vector<1x32xf32> to vector<10x32xf32>
    %193 = arith.addf %191, %192 : vector<10x32xf32>
    %c1 = arith.constant 1 : index
    %c0_70 = arith.constant 0 : index
    %c0_71 = arith.constant 0 : index
    %194 = vector.load %arg9[%c1, %c0_70, %c0_71] : memref<2x3x128xf32, #tpu.memory_space<vmem>>, vector<1x3x128xf32>
    %195 = vector.shape_cast %194 : vector<1x3x128xf32> to vector<3x128xf32>
    %196 = vector.extract_strided_slice %195 {offsets = [0, 0], sizes = [1, 32], strides = [1, 1]} : vector<3x128xf32> to vector<1x32xf32>
    %197 = vector.extract_strided_slice %195 {offsets = [0, 32], sizes = [1, 32], strides = [1, 1]} : vector<3x128xf32> to vector<1x32xf32>
    %198 = vector.extract_strided_slice %195 {offsets = [0, 64], sizes = [1, 32], strides = [1, 1]} : vector<3x128xf32> to vector<1x32xf32>
    %199 = vector.extract_strided_slice %195 {offsets = [0, 96], sizes = [1, 32], strides = [1, 1]} : vector<3x128xf32> to vector<1x32xf32>
    %200 = vector.extract_strided_slice %195 {offsets = [1, 0], sizes = [1, 96], strides = [1, 1]} : vector<3x128xf32> to vector<1x96xf32>
    %201 = vector.extract_strided_slice %195 {offsets = [1, 96], sizes = [1, 32], strides = [1, 1]} : vector<3x128xf32> to vector<1x32xf32>
    %202 = vector.extract_strided_slice %195 {offsets = [2, 0], sizes = [1, 64], strides = [1, 1]} : vector<3x128xf32> to vector<1x64xf32>
    %203 = vector.extract_strided_slice %195 {offsets = [2, 64], sizes = [1, 32], strides = [1, 1]} : vector<3x128xf32> to vector<1x32xf32>
    %cst_72 = arith.constant dense<0.000000e+00> : vector<10xf32>
    %204 = vector.multi_reduction <add>, %193, %cst_72 [1] : vector<10x32xf32> to vector<10xf32>
    %205 = vector.shape_cast %204 : vector<10xf32> to vector<10x1xf32>
    %cst_73 = arith.constant 3.200000e+01 : f32
    %206 = vector.broadcast %cst_73 : f32 to vector<10x1xf32>
    %207 = arith.divf %205, %206 : vector<10x1xf32>
    %208 = vector.broadcast %207 : vector<10x1xf32> to vector<10x32xf32>
    %209 = arith.subf %193, %208 : vector<10x32xf32>
    %210 = arith.mulf %209, %209 : vector<10x32xf32>
    %cst_74 = arith.constant dense<0.000000e+00> : vector<10xf32>
    %211 = vector.multi_reduction <add>, %210, %cst_74 [1] : vector<10x32xf32> to vector<10xf32>
    %212 = vector.shape_cast %211 : vector<10xf32> to vector<10x1xf32>
    %cst_75 = arith.constant 3.200000e+01 : f32
    %213 = vector.broadcast %cst_75 : f32 to vector<10x1xf32>
    %214 = arith.divf %212, %213 : vector<10x1xf32>
    %215 = vector.broadcast %207 : vector<10x1xf32> to vector<10x32xf32>
    %216 = arith.subf %193, %215 : vector<10x32xf32>
    %cst_76 = arith.constant 9.99999974E-6 : f32
    %217 = vector.broadcast %cst_76 : f32 to vector<10x1xf32>
    %218 = arith.addf %214, %217 : vector<10x1xf32>
    %219 = math.rsqrt %218 : vector<10x1xf32>
    %220 = vector.broadcast %219 : vector<10x1xf32> to vector<10x32xf32>
    %221 = arith.mulf %216, %220 : vector<10x32xf32>
    %222 = vector.broadcast %196 : vector<1x32xf32> to vector<10x32xf32>
    %223 = arith.mulf %221, %222 : vector<10x32xf32>
    %224 = vector.broadcast %197 : vector<1x32xf32> to vector<10x32xf32>
    %225 = arith.addf %223, %224 : vector<10x32xf32>
    %c1_77 = arith.constant 1 : index
    %c0_78 = arith.constant 0 : index
    %c0_79 = arith.constant 0 : index
    %226 = vector.load %arg5[%c1_77, %c0_78, %c0_79] : memref<2x32x96xf32, #tpu.memory_space<vmem>>, vector<1x32x96xf32>
    %227 = vector.shape_cast %226 : vector<1x32x96xf32> to vector<32x96xf32>
    %cst_80 = arith.constant dense<0.000000e+00> : vector<10x96xf32>
    %228 = tpu.matmul %225, %227, %cst_80 {dimension_numbers = #tpu.dot_dimension_numbers<[1], [0], [0], [1], [0, 0, 1, 1], [], []>} : vector<10x32xf32>, vector<32x96xf32>, vector<10x96xf32> -> vector<10x96xf32>
    %229 = vector.broadcast %200 : vector<1x96xf32> to vector<10x96xf32>
    %230 = arith.addf %228, %229 : vector<10x96xf32>
    %231 = vector.extract_strided_slice %230 {offsets = [0, 0], sizes = [10, 8], strides = [1, 1]} : vector<10x96xf32> to vector<10x8xf32>
    %232 = vector.extract_strided_slice %230 {offsets = [0, 32], sizes = [10, 8], strides = [1, 1]} : vector<10x96xf32> to vector<10x8xf32>
    %233 = vector.extract_strided_slice %230 {offsets = [0, 64], sizes = [10, 8], strides = [1, 1]} : vector<10x96xf32> to vector<10x8xf32>
    %cst_81 = arith.constant dense<0.000000e+00> : vector<10x10xf32>
    %234 = tpu.matmul %231, %232, %cst_81 {dimension_numbers = #tpu.dot_dimension_numbers<[1], [1], [0], [0], [0, 0, 1, 0], [], []>} : vector<10x8xf32>, vector<10x8xf32>, vector<10x10xf32> -> vector<10x10xf32>
    %cst_82 = arith.constant 0.353553385 : f32
    %235 = vector.broadcast %cst_82 : f32 to vector<10x10xf32>
    %236 = arith.mulf %234, %235 : vector<10x10xf32>
    %cst_83 = arith.constant -1.000000e+30 : f32
    %237 = vector.broadcast %cst_83 : f32 to vector<10x10xf32>
    %238 = arith.select %32, %236, %237 : vector<10x10xi1>, vector<10x10xf32>
    %cst_84 = arith.constant dense<0xFF800000> : vector<10xf32>
    %239 = vector.multi_reduction <maximumf>, %238, %cst_84 [1] : vector<10x10xf32> to vector<10xf32>
    %240 = vector.shape_cast %239 : vector<10xf32> to vector<10x1xf32>
    %241 = vector.broadcast %240 : vector<10x1xf32> to vector<10x10xf32>
    %242 = arith.subf %238, %241 : vector<10x10xf32>
    %243 = math.exp %242 : vector<10x10xf32>
    %cst_85 = arith.constant dense<0.000000e+00> : vector<10xf32>
    %244 = vector.multi_reduction <add>, %243, %cst_85 [1] : vector<10x10xf32> to vector<10xf32>
    %245 = vector.shape_cast %244 : vector<10xf32> to vector<10x1xf32>
    %246 = tpu.reciprocal %245 {approx = true} : vector<10x1xf32> -> vector<10x1xf32>
    %247 = vector.broadcast %246 : vector<10x1xf32> to vector<10x10xf32>
    %248 = arith.mulf %243, %247 : vector<10x10xf32>
    %cst_86 = arith.constant dense<0.000000e+00> : vector<10x8xf32>
    %249 = tpu.matmul %248, %233, %cst_86 {dimension_numbers = #tpu.dot_dimension_numbers<[1], [0], [0], [1], [0, 0, 1, 1], [], []>} : vector<10x10xf32>, vector<10x8xf32>, vector<10x8xf32> -> vector<10x8xf32>
    %250 = vector.extract_strided_slice %230 {offsets = [0, 8], sizes = [10, 8], strides = [1, 1]} : vector<10x96xf32> to vector<10x8xf32>
    %251 = vector.extract_strided_slice %230 {offsets = [0, 40], sizes = [10, 8], strides = [1, 1]} : vector<10x96xf32> to vector<10x8xf32>
    %252 = vector.extract_strided_slice %230 {offsets = [0, 72], sizes = [10, 8], strides = [1, 1]} : vector<10x96xf32> to vector<10x8xf32>
    %cst_87 = arith.constant dense<0.000000e+00> : vector<10x10xf32>
    %253 = tpu.matmul %250, %251, %cst_87 {dimension_numbers = #tpu.dot_dimension_numbers<[1], [1], [0], [0], [0, 0, 1, 0], [], []>} : vector<10x8xf32>, vector<10x8xf32>, vector<10x10xf32> -> vector<10x10xf32>
    %cst_88 = arith.constant 0.353553385 : f32
    %254 = vector.broadcast %cst_88 : f32 to vector<10x10xf32>
    %255 = arith.mulf %253, %254 : vector<10x10xf32>
    %cst_89 = arith.constant -1.000000e+30 : f32
    %256 = vector.broadcast %cst_89 : f32 to vector<10x10xf32>
    %257 = arith.select %32, %255, %256 : vector<10x10xi1>, vector<10x10xf32>
    %cst_90 = arith.constant dense<0xFF800000> : vector<10xf32>
    %258 = vector.multi_reduction <maximumf>, %257, %cst_90 [1] : vector<10x10xf32> to vector<10xf32>
    %259 = vector.shape_cast %258 : vector<10xf32> to vector<10x1xf32>
    %260 = vector.broadcast %259 : vector<10x1xf32> to vector<10x10xf32>
    %261 = arith.subf %257, %260 : vector<10x10xf32>
    %262 = math.exp %261 : vector<10x10xf32>
    %cst_91 = arith.constant dense<0.000000e+00> : vector<10xf32>
    %263 = vector.multi_reduction <add>, %262, %cst_91 [1] : vector<10x10xf32> to vector<10xf32>
    %264 = vector.shape_cast %263 : vector<10xf32> to vector<10x1xf32>
    %265 = tpu.reciprocal %264 {approx = true} : vector<10x1xf32> -> vector<10x1xf32>
    %266 = vector.broadcast %265 : vector<10x1xf32> to vector<10x10xf32>
    %267 = arith.mulf %262, %266 : vector<10x10xf32>
    %cst_92 = arith.constant dense<0.000000e+00> : vector<10x8xf32>
    %268 = tpu.matmul %267, %252, %cst_92 {dimension_numbers = #tpu.dot_dimension_numbers<[1], [0], [0], [1], [0, 0, 1, 1], [], []>} : vector<10x10xf32>, vector<10x8xf32>, vector<10x8xf32> -> vector<10x8xf32>
    %269 = vector.extract_strided_slice %230 {offsets = [0, 16], sizes = [10, 8], strides = [1, 1]} : vector<10x96xf32> to vector<10x8xf32>
    %270 = vector.extract_strided_slice %230 {offsets = [0, 48], sizes = [10, 8], strides = [1, 1]} : vector<10x96xf32> to vector<10x8xf32>
    %271 = vector.extract_strided_slice %230 {offsets = [0, 80], sizes = [10, 8], strides = [1, 1]} : vector<10x96xf32> to vector<10x8xf32>
    %cst_93 = arith.constant dense<0.000000e+00> : vector<10x10xf32>
    %272 = tpu.matmul %269, %270, %cst_93 {dimension_numbers = #tpu.dot_dimension_numbers<[1], [1], [0], [0], [0, 0, 1, 0], [], []>} : vector<10x8xf32>, vector<10x8xf32>, vector<10x10xf32> -> vector<10x10xf32>
    %cst_94 = arith.constant 0.353553385 : f32
    %273 = vector.broadcast %cst_94 : f32 to vector<10x10xf32>
    %274 = arith.mulf %272, %273 : vector<10x10xf32>
    %cst_95 = arith.constant -1.000000e+30 : f32
    %275 = vector.broadcast %cst_95 : f32 to vector<10x10xf32>
    %276 = arith.select %32, %274, %275 : vector<10x10xi1>, vector<10x10xf32>
    %cst_96 = arith.constant dense<0xFF800000> : vector<10xf32>
    %277 = vector.multi_reduction <maximumf>, %276, %cst_96 [1] : vector<10x10xf32> to vector<10xf32>
    %278 = vector.shape_cast %277 : vector<10xf32> to vector<10x1xf32>
    %279 = vector.broadcast %278 : vector<10x1xf32> to vector<10x10xf32>
    %280 = arith.subf %276, %279 : vector<10x10xf32>
    %281 = math.exp %280 : vector<10x10xf32>
    %cst_97 = arith.constant dense<0.000000e+00> : vector<10xf32>
    %282 = vector.multi_reduction <add>, %281, %cst_97 [1] : vector<10x10xf32> to vector<10xf32>
    %283 = vector.shape_cast %282 : vector<10xf32> to vector<10x1xf32>
    %284 = tpu.reciprocal %283 {approx = true} : vector<10x1xf32> -> vector<10x1xf32>
    %285 = vector.broadcast %284 : vector<10x1xf32> to vector<10x10xf32>
    %286 = arith.mulf %281, %285 : vector<10x10xf32>
    %cst_98 = arith.constant dense<0.000000e+00> : vector<10x8xf32>
    %287 = tpu.matmul %286, %271, %cst_98 {dimension_numbers = #tpu.dot_dimension_numbers<[1], [0], [0], [1], [0, 0, 1, 1], [], []>} : vector<10x10xf32>, vector<10x8xf32>, vector<10x8xf32> -> vector<10x8xf32>
    %288 = vector.extract_strided_slice %230 {offsets = [0, 24], sizes = [10, 8], strides = [1, 1]} : vector<10x96xf32> to vector<10x8xf32>
    %289 = vector.extract_strided_slice %230 {offsets = [0, 56], sizes = [10, 8], strides = [1, 1]} : vector<10x96xf32> to vector<10x8xf32>
    %290 = vector.extract_strided_slice %230 {offsets = [0, 88], sizes = [10, 8], strides = [1, 1]} : vector<10x96xf32> to vector<10x8xf32>
    %cst_99 = arith.constant dense<0.000000e+00> : vector<10x10xf32>
    %291 = tpu.matmul %288, %289, %cst_99 {dimension_numbers = #tpu.dot_dimension_numbers<[1], [1], [0], [0], [0, 0, 1, 0], [], []>} : vector<10x8xf32>, vector<10x8xf32>, vector<10x10xf32> -> vector<10x10xf32>
    %cst_100 = arith.constant 0.353553385 : f32
    %292 = vector.broadcast %cst_100 : f32 to vector<10x10xf32>
    %293 = arith.mulf %291, %292 : vector<10x10xf32>
    %cst_101 = arith.constant -1.000000e+30 : f32
    %294 = vector.broadcast %cst_101 : f32 to vector<10x10xf32>
    %295 = arith.select %32, %293, %294 : vector<10x10xi1>, vector<10x10xf32>
    %cst_102 = arith.constant dense<0xFF800000> : vector<10xf32>
    %296 = vector.multi_reduction <maximumf>, %295, %cst_102 [1] : vector<10x10xf32> to vector<10xf32>
    %297 = vector.shape_cast %296 : vector<10xf32> to vector<10x1xf32>
    %298 = vector.broadcast %297 : vector<10x1xf32> to vector<10x10xf32>
    %299 = arith.subf %295, %298 : vector<10x10xf32>
    %300 = math.exp %299 : vector<10x10xf32>
    %cst_103 = arith.constant dense<0.000000e+00> : vector<10xf32>
    %301 = vector.multi_reduction <add>, %300, %cst_103 [1] : vector<10x10xf32> to vector<10xf32>
    %302 = vector.shape_cast %301 : vector<10xf32> to vector<10x1xf32>
    %303 = tpu.reciprocal %302 {approx = true} : vector<10x1xf32> -> vector<10x1xf32>
    %304 = vector.broadcast %303 : vector<10x1xf32> to vector<10x10xf32>
    %305 = arith.mulf %300, %304 : vector<10x10xf32>
    %cst_104 = arith.constant dense<0.000000e+00> : vector<10x8xf32>
    %306 = tpu.matmul %305, %290, %cst_104 {dimension_numbers = #tpu.dot_dimension_numbers<[1], [0], [0], [1], [0, 0, 1, 1], [], []>} : vector<10x10xf32>, vector<10x8xf32>, vector<10x8xf32> -> vector<10x8xf32>
    %307 = tpu.concatenate %249, %268, %287, %306 in 1 : vector<10x8xf32>, vector<10x8xf32>, vector<10x8xf32>, vector<10x8xf32> -> vector<10x32xf32>
    %c1_105 = arith.constant 1 : index
    %c0_106 = arith.constant 0 : index
    %c0_107 = arith.constant 0 : index
    %308 = vector.load %arg6[%c1_105, %c0_106, %c0_107] : memref<2x32x32xf32, #tpu.memory_space<vmem>>, vector<1x32x32xf32>
    %309 = vector.shape_cast %308 : vector<1x32x32xf32> to vector<32x32xf32>
    %cst_108 = arith.constant dense<0.000000e+00> : vector<10x32xf32>
    %310 = tpu.matmul %307, %309, %cst_108 {dimension_numbers = #tpu.dot_dimension_numbers<[1], [0], [0], [1], [0, 0, 1, 1], [], []>} : vector<10x32xf32>, vector<32x32xf32>, vector<10x32xf32> -> vector<10x32xf32>
    %311 = arith.addf %193, %310 : vector<10x32xf32>
    %312 = vector.broadcast %201 : vector<1x32xf32> to vector<10x32xf32>
    %313 = arith.addf %311, %312 : vector<10x32xf32>
    %cst_109 = arith.constant dense<0.000000e+00> : vector<10xf32>
    %314 = vector.multi_reduction <add>, %313, %cst_109 [1] : vector<10x32xf32> to vector<10xf32>
    %315 = vector.shape_cast %314 : vector<10xf32> to vector<10x1xf32>
    %cst_110 = arith.constant 3.200000e+01 : f32
    %316 = vector.broadcast %cst_110 : f32 to vector<10x1xf32>
    %317 = arith.divf %315, %316 : vector<10x1xf32>
    %318 = vector.broadcast %317 : vector<10x1xf32> to vector<10x32xf32>
    %319 = arith.subf %313, %318 : vector<10x32xf32>
    %320 = arith.mulf %319, %319 : vector<10x32xf32>
    %cst_111 = arith.constant dense<0.000000e+00> : vector<10xf32>
    %321 = vector.multi_reduction <add>, %320, %cst_111 [1] : vector<10x32xf32> to vector<10xf32>
    %322 = vector.shape_cast %321 : vector<10xf32> to vector<10x1xf32>
    %cst_112 = arith.constant 3.200000e+01 : f32
    %323 = vector.broadcast %cst_112 : f32 to vector<10x1xf32>
    %324 = arith.divf %322, %323 : vector<10x1xf32>
    %325 = vector.broadcast %317 : vector<10x1xf32> to vector<10x32xf32>
    %326 = arith.subf %313, %325 : vector<10x32xf32>
    %cst_113 = arith.constant 9.99999974E-6 : f32
    %327 = vector.broadcast %cst_113 : f32 to vector<10x1xf32>
    %328 = arith.addf %324, %327 : vector<10x1xf32>
    %329 = math.rsqrt %328 : vector<10x1xf32>
    %330 = vector.broadcast %329 : vector<10x1xf32> to vector<10x32xf32>
    %331 = arith.mulf %326, %330 : vector<10x32xf32>
    %332 = vector.broadcast %198 : vector<1x32xf32> to vector<10x32xf32>
    %333 = arith.mulf %331, %332 : vector<10x32xf32>
    %334 = vector.broadcast %199 : vector<1x32xf32> to vector<10x32xf32>
    %335 = arith.addf %333, %334 : vector<10x32xf32>
    %c1_114 = arith.constant 1 : index
    %c0_115 = arith.constant 0 : index
    %c0_116 = arith.constant 0 : index
    %336 = vector.load %arg7[%c1_114, %c0_115, %c0_116] : memref<2x32x64xf32, #tpu.memory_space<vmem>>, vector<1x32x64xf32>
    %337 = vector.shape_cast %336 : vector<1x32x64xf32> to vector<32x64xf32>
    %cst_117 = arith.constant dense<0.000000e+00> : vector<10x64xf32>
    %338 = tpu.matmul %335, %337, %cst_117 {dimension_numbers = #tpu.dot_dimension_numbers<[1], [0], [0], [1], [0, 0, 1, 1], [], []>} : vector<10x32xf32>, vector<32x64xf32>, vector<10x64xf32> -> vector<10x64xf32>
    %339 = vector.broadcast %202 : vector<1x64xf32> to vector<10x64xf32>
    %340 = arith.addf %338, %339 : vector<10x64xf32>
    %cst_118 = arith.constant 1.702000e+00 : f32
    %341 = vector.broadcast %cst_118 : f32 to vector<10x64xf32>
    %342 = arith.mulf %341, %340 : vector<10x64xf32>
    %343 = arith.negf %342 : vector<10x64xf32>
    %344 = math.exp %343 : vector<10x64xf32>
    %cst_119 = arith.constant 1.000000e+00 : f32
    %345 = vector.broadcast %cst_119 : f32 to vector<10x64xf32>
    %346 = arith.addf %345, %344 : vector<10x64xf32>
    %347 = arith.divf %345, %346 : vector<10x64xf32>
    %348 = arith.mulf %340, %347 : vector<10x64xf32>
    %c1_120 = arith.constant 1 : index
    %c0_121 = arith.constant 0 : index
    %c0_122 = arith.constant 0 : index
    %349 = vector.load %arg8[%c1_120, %c0_121, %c0_122] : memref<2x64x32xf32, #tpu.memory_space<vmem>>, vector<1x64x32xf32>
    %350 = vector.shape_cast %349 : vector<1x64x32xf32> to vector<64x32xf32>
    %cst_123 = arith.constant dense<0.000000e+00> : vector<10x32xf32>
    %351 = tpu.matmul %348, %350, %cst_123 {dimension_numbers = #tpu.dot_dimension_numbers<[1], [0], [0], [1], [0, 0, 1, 1], [], []>} : vector<10x64xf32>, vector<64x32xf32>, vector<10x32xf32> -> vector<10x32xf32>
    %352 = arith.addf %313, %351 : vector<10x32xf32>
    %353 = vector.broadcast %203 : vector<1x32xf32> to vector<10x32xf32>
    %354 = arith.addf %352, %353 : vector<10x32xf32>
    %355 = vector.extract_strided_slice %5 {offsets = [0, 64], sizes = [1, 32], strides = [1, 1]} : vector<1x128xf32> to vector<1x32xf32>
    %356 = vector.extract_strided_slice %5 {offsets = [0, 96], sizes = [1, 32], strides = [1, 1]} : vector<1x128xf32> to vector<1x32xf32>
    %cst_124 = arith.constant dense<0.000000e+00> : vector<10xf32>
    %357 = vector.multi_reduction <add>, %354, %cst_124 [1] : vector<10x32xf32> to vector<10xf32>
    %358 = vector.shape_cast %357 : vector<10xf32> to vector<10x1xf32>
    %cst_125 = arith.constant 3.200000e+01 : f32
    %359 = vector.broadcast %cst_125 : f32 to vector<10x1xf32>
    %360 = arith.divf %358, %359 : vector<10x1xf32>
    %361 = vector.broadcast %360 : vector<10x1xf32> to vector<10x32xf32>
    %362 = arith.subf %354, %361 : vector<10x32xf32>
    %363 = arith.mulf %362, %362 : vector<10x32xf32>
    %cst_126 = arith.constant dense<0.000000e+00> : vector<10xf32>
    %364 = vector.multi_reduction <add>, %363, %cst_126 [1] : vector<10x32xf32> to vector<10xf32>
    %365 = vector.shape_cast %364 : vector<10xf32> to vector<10x1xf32>
    %cst_127 = arith.constant 3.200000e+01 : f32
    %366 = vector.broadcast %cst_127 : f32 to vector<10x1xf32>
    %367 = arith.divf %365, %366 : vector<10x1xf32>
    %368 = vector.broadcast %360 : vector<10x1xf32> to vector<10x32xf32>
    %369 = arith.subf %354, %368 : vector<10x32xf32>
    %cst_128 = arith.constant 9.99999974E-6 : f32
    %370 = vector.broadcast %cst_128 : f32 to vector<10x1xf32>
    %371 = arith.addf %367, %370 : vector<10x1xf32>
    %372 = math.rsqrt %371 : vector<10x1xf32>
    %373 = vector.broadcast %372 : vector<10x1xf32> to vector<10x32xf32>
    %374 = arith.mulf %369, %373 : vector<10x32xf32>
    %375 = vector.broadcast %355 : vector<1x32xf32> to vector<10x32xf32>
    %376 = arith.mulf %374, %375 : vector<10x32xf32>
    %377 = vector.broadcast %356 : vector<1x32xf32> to vector<10x32xf32>
    %378 = arith.addf %376, %377 : vector<10x32xf32>
    %c0_129 = arith.constant 0 : index
    %c0_130 = arith.constant 0 : index
    %379 = vector.load %arg10[%c0_129, %c0_130] : memref<10x32xf32, #tpu.memory_space<vmem>>, vector<10x32xf32>
    tpu.vector_store %arg10[%c0_129, %c0_130], %378 {strides = array<i32>} : memref<10x32xf32, #tpu.memory_space<vmem>>, vector<10x32xf32>,
    return
  }
}

</mosaic_0001>

<bundles_post_ra>
// kernel: clip_vision_forward.1
= control target key start
LH: loop header
LB: loop body
LE: loop exit
PB: predicated region body
PF: predicated region fallthrough
CT: control target
= control target key end

     0   :  { %v3711_v0 = vmov 0.0|0.0   ;;  %vm65_vm0 = vcmask 523264   ;;  %vm148_vm1 = vcmask 261120   ;;  %vm152_vm2 = vcmask 254976   ;;  %s3712_s13 = smov 96   ;;  %s3714_s27 = smov 120   ;;  %s4477_s1 = inlined_call_operand.vmem [shape: f32[192,32], index: 1, kind: input, shape index: {}]   ;;  %s4478_s0 = inlined_call_operand.vmem [shape: f32[10,192], index: 0, kind: input, shape index: {}]   ;;  %s4479_s2 = inlined_call_operand.vmem [shape: f32[10,32], index: 2, kind: input, shape index: {}]   ;;  %s4480_s4 = inlined_call_operand.vmem [shape: f32[1,128], index: 4, kind: input, shape index: {}]   ;;  %s4481_s9 = inlined_call_operand.vmem [shape: f32[2,3,128], index: 9, kind: input, shape index: {}]   ;;  %s4482_s5 = inlined_call_operand.vmem [shape: f32[2,32,96], index: 5, kind: input, shape index: {}]   ;;  %s4483_s3 = inlined_call_operand.vmem [shape: f32[10,10], index: 3, kind: input, shape index: {}]   ;;  %s4484_s6 = inlined_call_operand.vmem [shape: f32[2,32,32], index: 6, kind: input, shape index: {}]   ;;  %s4485_s7 = inlined_call_operand.vmem [shape: f32[2,32,64], index: 7, kind: input, shape index: {}]   ;;  %s4486_s8 = inlined_call_operand.vmem [shape: f32[2,64,32], index: 8, kind: input, shape index: {}]   ;;  %s4487_s10 = inlined_call_operand.vmem [shape: f32[10,32], index: 10, kind: output, shape index: {}]  }
   0x1   :  { %3297 = vmatprep.subr.bf16.mxu0 %v3711_v0  ;;  %v39_v1 = vld [vmem:[%s4477_s1] sm:$0xff]  ;;  %v40_v2 = vld [vmem:[%s4477_s1 + $0x8] sm:$0xff]  ;;  %v41_v3 = vld [vmem:[%s4477_s1 + $0x10] sm:$0xff]  ;;  %vm328_vm3 = vcmask 64512   ;;  %vm420_vm6 = vcmask 74752   ;;  %vm416_vm8 = vcmask 80896  }
   0x2   :  { %v3298_v4 = vpack.c.bf16 %v40_v2, %v39_v1  ;;  %v42_v5 = vld [vmem:[%s4477_s1 + $0x18] sm:$0xff]  ;;  %v43_v7 = vld [vmem:[%s4477_s1 + $0x20] sm:$0xff]  ;;  %v44_v8 = vld [vmem:[%s4477_s1 + $0x28] sm:$0xff]  ;;  %s3715_s28 = smov 64   ;;  %vm451_vm9 = vcmask 1041408   ;;  %vm3716_vm10 = vmmov 1  }
   0x3   :  { %v3301_v6 = vpack.c.bf16 %v42_v5, %v41_v3  ;;  %v3304_v9 = vpack.c.bf16 %v44_v8, %v43_v7  ;;  %v45_v10 = vld [vmem:[%s4477_s1 + $0x30] sm:$0xff]  ;;  %v46_v11 = vld [vmem:[%s4477_s1 + $0x38] sm:$0xff]  ;;  %v36_v12 = vld [vmem:[%s4478_s0 + $0x8] sm:$0xff]  ;;  %s3718_s29 = smov 112   ;;  %s3719_s30 = smov 80   ;;  %vm1170_vm12 = vcmask 130048  }
   0x4   :  { %3299 = vmatpush1.bf16.msra.mxu0 %v3298_v4  ;;  %2861 = vmatprep.mubr.msk.f32.mxu0 %vm65_vm0, %v36_v12  ;;  %v3307_v13 = vpack.c.bf16 %v46_v11, %v45_v10  ;;  %v47_v14 = vld [vmem:[%s4477_s1 + $0x40] sm:$0xff]  ;;  %v48_v15 = vld [vmem:[%s4477_s1 + $0x48] sm:$0xff]  ;;  %v49_v17 = vld [vmem:[%s4477_s1 + $0x50] sm:$0xff]  ;;  %s3720_s11 = smov 48   ;;  %s3722_s12 = smov 72   ;;  %vm1173_vm13 = vcmask 195584  }
   0x5   :  { %3300 = vmatprep.subr.bf16.mxu0 %v3711_v0  ;;  %v3310_v16 = vpack.c.bf16 %v48_v15, %v47_v14  ;;  %v50_v18 = vld [vmem:[%s4477_s1 + $0x58] sm:$0xff]  ;;  %v51_v20 = vld [vmem:[%s4477_s1 + $0x60] sm:$0xff]  ;;  %v52_v21 = vld [vmem:[%s4477_s1 + $0x68] sm:$0xff]  ;;  %s3724_s14 = smov 8   ;;  %s3725_s15 = smov 16  }
   0x6   :  { %v3313_v19 = vpack.c.bf16 %v50_v18, %v49_v17  ;;  %v3316_v22 = vpack.c.bf16 %v52_v21, %v51_v20  ;;  %v53_v23 = vld [vmem:[%s4477_s1 + $0x70] sm:$0xff]  ;;  %v54_v24 = vld [vmem:[%s4477_s1 + $0x78] sm:$0xff]  ;;  %v55_v26 = vld [vmem:[%s4477_s1 + $0x80] sm:$0xff]  ;;  %s3726_s24 = smov 24   ;;  %s3727_s25 = smov 32  }
   0x7   :  { %v3319_v25 = vpack.c.bf16 %v54_v24, %v53_v23  ;;  %v56_v27 = vld [vmem:[%s4477_s1 + $0x88] sm:$0xff]  ;;  %v57_v29 = vld [vmem:[%s4477_s1 + $0x90] sm:$0xff]  ;;  %v58_v30 = vld [vmem:[%s4477_s1 + $0x98] sm:$0xff] }
   0x8   :  { %3302 = vmatpush1.bf16.msra.mxu0 %v3301_v6  ;;  %v3322_v28 = vpack.c.bf16 %v56_v27, %v55_v26  ;;  %v3325_v31 = vpack.c.bf16 %v58_v30, %v57_v29  ;;  %v59_v32 = vld [vmem:[%s4477_s1 + $0xa0] sm:$0xff]  ;;  %v60_v33 = vld [vmem:[%s4477_s1 + $0xa8] sm:$0xff]  ;;  %v61_v35 = vld [vmem:[%s4477_s1 + $0xb0] sm:$0xff] }
   0x9   :  { %3303 = vmatprep.subr.bf16.mxu0 %v3711_v0  ;;  %v3328_v34 = vpack.c.bf16 %v60_v33, %v59_v32  ;;  %v62_v36 = vld [vmem:[%s4477_s1 + $0xb8] sm:$0xff]  ;;  %v35_v38 = vld [vmem:[%s4478_s0] sm:$0xff]  ;;  %v37_v40 = vld [vmem:[%s4478_s0 + $0x10] sm:$0x3]  ;;  %s3717_s1 = smov 56  }
   0xa   :  { %v3331_v37 = vpack.c.bf16 %v62_v36, %v61_v35  ;;  %v38_v39 = vld [vmem:[%s4478_s0 + $0x18] sm:$0x3]  ;;  %v63_v41 = vld [vmem:[%s4479_s2] sm:$0xff]  ;;  %v64_v45 = vld [vmem:[%s4479_s2 + $0x8] sm:$0x3]  ;;  %s3721_s0 = smov 104  }
   0xb   :  { %v2863_v51 = vld [vmem:[%s4480_s4] ss:$0 sm:$0xff]  ;;  %v235_v33 = vld [vmem:[%s4482_s5 + $0x10] sm:$0xff]  ;;  %vm3960_vm4 = vmpackc.low %vm328_vm3, %vm328_vm3  ;;  %s3723_s2 = smov 40  }
   0xc   :  { %3305 = vmatpush1.bf16.msra.mxu0 %v3304_v9  ;;  %v233_v30 = vld [vmem:[%s4482_s5] sm:$0xff]  ;;  %vm3998_vm11 = vmpackc.low %vm451_vm9, %vm3716_vm10 }
   0xd   :  { %3306 = vmatprep.subr.bf16.mxu0 %v3711_v0 }
  0x10   :  { %3308 = vmatpush1.bf16.msra.mxu0 %v3307_v13 }
  0x11   :  { %3309 = vmatprep.subr.bf16.mxu0 %v3711_v0 }
  0x14   :  { %3311 = vmatpush1.bf16.msra.mxu0 %v3310_v16 }
  0x15   :  { %3312 = vmatprep.subr.bf16.mxu0 %v3711_v0 }
  0x18   :  { %3314 = vmatpush1.bf16.msra.mxu0 %v3313_v19 }
  0x19   :  { %3315 = vmatprep.subr.bf16.mxu0 %v3711_v0 }
  0x1c   :  { %3317 = vmatpush1.bf16.msra.mxu0 %v3316_v22 }
  0x1d   :  { %3318 = vmatprep.subr.bf16.mxu0 %v3711_v0 }
  0x20   :  { %3320 = vmatpush1.bf16.msra.mxu0 %v3319_v25  ;;  %v221_v25 = vlaneseq }
  0x21   :  { %3321 = vmatprep.subr.bf16.mxu0 %v3711_v0 }
  0x22   :  { %v3907_v26 = vshrl.u32 %v221_v25, 7 }
  0x24   :  { %3323 = vmatpush1.bf16.msra.mxu0 %v3322_v28  ;;  %v223_v27 = vsub.s32 0, %v3907_v26  ;;  %v3913_v28 = vld [vmem:[%s4481_s9] sm:$0x7] }
  0x25   :  { %3324 = vmatprep.subr.bf16.mxu0 %v3711_v0 }
  0x26   :  { %v3918_v29 = vrot.slane %v3913_v28, %v223_v27 }
  0x28   :  { %3326 = vmatpush1.bf16.msra.mxu0 %v3325_v31  ;;  %v234_v31 = vld [vmem:[%s4482_s5 + $0x8] sm:$0xff] }
  0x29   :  { %3327 = vmatprep.subr.bf16.mxu0 %v3711_v0  ;;  %v3333_v32 = vpack.c.bf16 %v234_v31, %v233_v30 }
  0x2c   :  { %3329 = vmatpush1.bf16.msra.mxu0 %v3328_v34  ;;  %v236_v34 = vld [vmem:[%s4482_s5 + $0x18] sm:$0xff] }
  0x2d   :  { %3330 = vmatprep.subr.bf16.mxu0 %v3711_v0  ;;  %v3337_v35 = vpack.c.bf16 %v236_v34, %v235_v33  ;;  %v2939_v33 = vld [vmem:[%s4484_s6 + $0x30] sm:$0xff] }
  0x30   :  { %3332 = vmatpush1.bf16.msra.mxu0 %v3331_v37 }
  0x31   :  { %3334 = vmatprep.subr.bf16.mxu0 %v3333_v32 }
  0x33   :  { %137 = vmatmul.mubr.f32.vlgmr.msra.gmra.mrb[0].mxu0 %v35_v38 }
  0x34   :  { %2862 = vmatprep.mubr.msk.f32.mxu0 %vm65_vm0, %v38_v39  ;;  %3336 = vmatpush3.bf16.msra.mxu0 %v3333_v32 }
  0x35   :  { %3338 = vmatprep.subr.bf16.mxu0 %v3337_v35 }
  0x37   :  { %142 = vmatmul.mubr.f32.gmra.mrb[2].mxu0 %v37_v40 }
  0x38   :  { %3340 = vmatpush3.bf16.msra.mxu0 %v3337_v35 }
 0x106   :  { %v138_v42 = vpop.f32.mrb[0].mxu0 }
 0x107   :  { %v139_v43 = vadd.f32 %v138_v42, %v63_v41  ;;  %v140_v44 = vpop.f32.mrb[1].mxu0 }
 0x109   :  { %v149_v46 = vsel %vm148_vm1, %v139_v43, 0.0 }
 0x10a   :  { %v143_v47 = vpop.f32.mrb[2].mxu0  ;;  %150 = vadd.xlane.f32.xlu0 %v149_v46 }
 0x10b   :  { %v144_v48 = vadd.f32 %v143_v47, %v64_v45  ;;  %v145_v49 = vpop.f32.mrb[3].mxu0 }
 0x10d   :  { %v153_v50 = vsel %vm152_vm2, %v144_v48, 0.0 }
 0x10e   :  { %154 = vadd.xlane.f32.xlu0 %v153_v50 }
 0x124   :  { %185 = vrot.lane.b32.xlu0 %v2863_v51, %s3712_s13 }
 0x197   :  { %v151_v52 = vpop.xlane.xlu0 %150 }
 0x198   :  { %v157_v53 = vmul.f32 0.03125, %v151_v52 }
 0x19a   :  { %v159_v54 = vsub.f32 %v139_v43, %v157_v53 }
 0x19b   :  { %v155_v55 = vpop.xlane.xlu0 %154 }
 0x19c   :  { %v158_v56 = vmul.f32 0.03125, %v155_v55  ;;  %v161_v57 = vmul.f32 %v159_v54, %v159_v54 }
 0x19e   :  { %v160_v58 = vsub.f32 %v144_v48, %v158_v56  ;;  %v163_v59 = vsel %vm148_vm1, %v161_v57, 0.0 }
 0x19f   :  { %164 = vadd.xlane.f32.xlu1 %v163_v59  ;;  %v186_v6 = vpop.permute.xlu0 %185 }
 0x1a0   :  { %v162_v60 = vmul.f32 %v160_v58, %v160_v58 }
 0x1a2   :  { %v166_v61 = vsel %vm152_vm2, %v162_v60, 0.0 }
 0x1a3   :  { %167 = vadd.xlane.f32.xlu1 %v166_v61 }
 0x22c   :  { %v165_v62 = vpop.xlane.xlu1 %164 }
 0x22d   :  { %v169_v63 = vmul.f32 0.03125, %v165_v62 }
 0x22f   :  { %v171_v0 = vadd.f32 1e-05, %v169_v63  ;;  %v3973_v63 = vld [vmem:[%s4483_s3 + $0x8] sm:$0x3] }
 0x230   :  { %v168_v1 = vpop.xlane.xlu1 %167  ;;  %vm193_vm5 = vcmp.gt.f32.partialorder %v3973_v63, 0.5 }
 0x231   :  { %3606 = vrsqrt.f32 %v171_v0  ;;  %v170_v2 = vmul.f32 0.03125, %v168_v1  ;;  %v3978_v0 = vld [vmem:[%s4483_s3] sm:$0xff]  ;;  %s3713_s3 = smov 88  }
 0x232   :  { %vm192_vm7 = vcmp.gt.f32.partialorder %v3978_v0, 0.5 }
 0x233   :  { %v172_v3 = vadd.f32 1e-05, %v170_v2 }
 0x235   :  { %3608 = vrsqrt.f32 %v172_v3 }
 0x23b   :  { %v3607_v4 = vpop.eup %3606 }
 0x23c   :  { %v175_v5 = vmul.f32 %v3607_v4, %v159_v54 }
 0x23e   :  { %v183_v7 = vmul.f32 %v2863_v51, %v175_v5 }
 0x23f   :  { %v3609_v8 = vpop.eup %3608 }
 0x240   :  { %v176_v9 = vmul.f32 %v3609_v8, %v160_v58  ;;  %v3895_v10 = vadd.f32 %v186_v6, %v183_v7 }
 0x242   :  { %v184_v11 = vmul.f32 %v2863_v51, %v176_v9  ;;  %v195_v12 = vsel %vm148_vm1, %v3895_v10, 0.0  ;;  %v239_v51 = vsub.s32 1, %v3907_v26 }
 0x243   :  { %196 = vadd.xlane.f32.xlu1 %v195_v12 }
 0x244   :  { %v3899_v13 = vadd.f32 %v186_v6, %v184_v11  ;;  %v3942_v52 = vrot.slane %v3913_v28, %v239_v51 }
 0x246   :  { %v198_v14 = vsel %vm152_vm2, %v3899_v13, 0.0 }
 0x247   :  { %199 = vadd.xlane.f32.xlu1 %v198_v14 }
 0x2d0   :  { %v197_v15 = vpop.xlane.xlu1 %196 }
 0x2d1   :  { %v201_v16 = vmul.f32 0.03125, %v197_v15 }
 0x2d3   :  { %v203_v17 = vsub.f32 %v3895_v10, %v201_v16 }
 0x2d4   :  { %v200_v18 = vpop.xlane.xlu1 %199 }
 0x2d5   :  { %v202_v19 = vmul.f32 0.03125, %v200_v18  ;;  %v205_v20 = vmul.f32 %v203_v17, %v203_v17 }
 0x2d7   :  { %v204_v21 = vsub.f32 %v3899_v13, %v202_v19  ;;  %v207_v22 = vsel %vm148_vm1, %v205_v20, 0.0 }
 0x2d8   :  { %208 = vadd.xlane.f32.xlu1 %v207_v22 }
 0x2d9   :  { %v206_v23 = vmul.f32 %v204_v21, %v204_v21 }
 0x2db   :  { %v210_v24 = vsel %vm152_vm2, %v206_v23, 0.0 }
 0x2dc   :  { %211 = vadd.xlane.f32.xlu1 %v210_v24 }
 0x2ed   :  { %228 = vrot.lane.b32.xlu1 %v3918_v29, %s3712_s13 }
 0x365   :  { %v209_v36 = vpop.xlane.xlu1 %208 }
 0x366   :  { %v213_v37 = vmul.f32 0.03125, %v209_v36 }
 0x368   :  { %v215_v38 = vadd.f32 1e-05, %v213_v37 }
 0x369   :  { %v212_v39 = vpop.xlane.xlu1 %211 }
 0x36a   :  { %3610 = vrsqrt.f32 %v215_v38  ;;  %v214_v40 = vmul.f32 0.03125, %v212_v39 }
 0x36c   :  { %v216_v41 = vadd.f32 1e-05, %v214_v40 }
 0x36d   :  { %v229_v44 = vpop.permute.xlu1 %228 }
 0x36e   :  { %3612 = vrsqrt.f32 %v216_v41 }
 0x374   :  { %v3611_v42 = vpop.eup %3610 }
 0x375   :  { %v219_v43 = vmul.f32 %v3611_v42, %v203_v17 }
 0x377   :  { %v225_v45 = vmul.f32 %v3918_v29, %v219_v43 }
 0x378   :  { %v3613_v46 = vpop.eup %3612 }
 0x379   :  { %v220_v47 = vmul.f32 %v3613_v46, %v204_v21  ;;  %v231_v48 = vadd.f32 %v229_v44, %v225_v45 }
 0x37b   :  { %v226_v49 = vmul.f32 %v3918_v29, %v220_v47  ;;  %3089 = vmatprep.mubr.msk.f32.mxu0 %vm148_vm1, %v231_v48 }
 0x37d   :  { %v232_v50 = vadd.f32 %v229_v44, %v226_v49 }
 0x37f   :  { %3090 = vmatmul.mubr.msk.f32.vlgmr.msra.gmra.mrb[4].mxu0 %vm148_vm1, %v232_v50 }
 0x452   :  { %v3091_v53 = vpop.f32.mrb[4].mxu0 }
 0x453   :  { %v3945_v54 = vadd.f32 %v3091_v53, %v3942_v52  ;;  %v313_v55 = vpop.f32.mrb[5].mxu0 }
 0x454   :  { %v3948_v56 = vadd.f32 %v313_v55, %v3942_v52 }
 0x456   :  { %3096 = vmatprep.mubr.msk.f32.mxu1 %vm328_vm3, %v3948_v56  ;;  %v3954_v57 = vpack.i.bf16 %v3945_v54, %v3948_v56 }
 0x458   :  { %3527 = vrot.lane.b32.xlu0 %v3954_v57, %s3712_s13 }
 0x4ca   :  { %v3528_v58 = vpop.permute.xlu0 %3527 }
 0x4cb   :  { %v3530_v59 = vunpack.i.h.bf16 %v3528_v58  ;;  %v3529_v60 = vunpack.i.l.bf16 %v3528_v58 }
 0x4cd   :  { %v3341_v62 = vpack.c.bf16 %v3530_v59, %v3529_v60 }
 0x4cf   :  { %3343 = vmatprep.subr.msk.bf16.mxu1 %vm3960_vm4, %v3341_v62 }
 0x4d0   :  { %3346 = vmatpush3.bf16.xpose.msk.msra.mxu1 %vm3960_vm4, %v3341_v62 }
 0x4d7   :  { %3097 = vmatmul.mubr.msk.f32.vlgmr.msra.gmra.mrb[0].mxu1 %vm328_vm3, %v3945_v54 }
 0x5aa   :  { %v3098_v1 = vpop.f32.mrb[0].mxu1 }
 0x5ab   :  { %v413_v2 = vmul.f32 0.35355338, %v3098_v1  ;;  %v403_v3 = vpop.f32.mrb[1].mxu1 }
 0x5ac   :  { %v412_v4 = vmul.f32 0.35355338, %v403_v3 }
 0x5ad   :  { %v415_v5 = vsel %vm193_vm5, %v413_v2, -1e+30 }
 0x5ae   :  { %v421_v6 = vsel %vm420_vm6, %v415_v5, -inf  ;;  %v414_v7 = vsel %vm192_vm7, %v412_v4, -1e+30 }
 0x5af   :  { %422 = vmax.xlane.f32.xlu1 %v421_v6  ;;  %v417_v8 = vsel %vm416_vm8, %v414_v7, -inf }
 0x5b0   :  { %418 = vmax.xlane.f32.xlu0 %v417_v8 }
 0x5c0   :  { %3537 = vrot.lane.b32.xlu1 %v3954_v57, %s3713_s3 }
 0x5c4   :  { %529 = vrot.lane.b32.xlu1 %v3948_v56, %s3714_s27 }
 0x63c   :  { %v423_v9 = vpop.xlane.xlu1 %422 }
 0x63d   :  { %v425_v11 = vsub.f32 %v415_v5, %v423_v9  ;;  %v419_v12 = vpop.xlane.xlu0 %418 }
 0x63e   :  { %v424_v14 = vsub.f32 %v414_v7, %v419_v12 }
 0x63f   :  { %v428_v15 = vmul.f32 1.442695, %v425_v11 }
 0x640   :  { %v426_v16 = vmul.f32 1.442695, %v424_v14  ;;  %v3538_v23 = vpop.permute.xlu1 %3537 }
 0x641   :  { %3614 = vpow2.f32 %v428_v15  ;;  %v3540_v25 = vunpack.i.h.bf16 %v3538_v23  ;;  %v3539_v30 = vunpack.i.l.bf16 %v3538_v23 }
 0x642   :  { %3616 = vpow2.f32 %v426_v16 }
 0x643   :  { %v3353_v35 = vpack.c.bf16 %v3540_v25, %v3539_v30 }
 0x644   :  { %v530_v40 = vpop.permute.xlu1 %529 }
 0x64b   :  { %v3615_v17 = vpop.eup %3614 }
 0x64c   :  { %v433_v18 = vsel %vm420_vm6, %v3615_v17, 0.0  ;;  %v3617_v19 = vpop.eup %3616 }
 0x64d   :  { %434 = vadd.xlane.f32.xlu0 %v433_v18  ;;  %v430_v20 = vsel %vm416_vm8, %v3617_v19, 0.0 }
 0x651   :  { %431 = vadd.xlane.f32.xlu0 %v430_v20 }
 0x667   :  { %3532 = vrot.lane.b32.xlu0 %v3954_v57, %s3715_s28 }
 0x66b   :  { %531 = vrot.lane.b32.xlu0 %v3945_v54, %s3714_s27 }
 0x6da   :  { %v435_v21 = vpop.xlane.xlu0 %434 }
 0x6db   :  { %3618 = vrcp.f32 %v435_v21 }
 0x6de   :  { %v432_v22 = vpop.xlane.xlu0 %431 }
 0x6df   :  { %3620 = vrcp.f32 %v432_v22 }
 0x6e2   :  { %v3533_v24 = vpop.permute.xlu0 %3532 }
 0x6e3   :  { %v3535_v31 = vunpack.i.h.bf16 %v3533_v24  ;;  %v3534_v32 = vunpack.i.l.bf16 %v3533_v24 }
 0x6e5   :  { %v3347_v34 = vpack.c.bf16 %v3535_v31, %v3534_v32  ;;  %v3619_v36 = vpop.eup %3618 }
 0x6e6   :  { %v439_v39 = vmul.f32 %v3619_v36, %v3615_v17  ;;  %v532_v41 = vpop.permute.xlu0 %531 }
 0x6e7   :  { %3349 = vmatprep.subr.msk.bf16.mxu1 %vm3998_vm11, %v3347_v34 }
 0x6e8   :  { %3352 = vmatpush3.bf16.msk.msra.mxu1 %vm3998_vm11, %v3347_v34 }
 0x6e9   :  { %v3621_v37 = vpop.eup %3620  ;;  %3355 = vmatprep.subr.msk.bf16.mxu1 %vm3960_vm4, %v3353_v35 }
 0x6ea   :  { %v438_v38 = vmul.f32 %v3621_v37, %v3617_v19 }
 0x6ec   :  { %3103 = vmatprep.mubr.msk.f32.mxu1 %vm416_vm8, %v438_v38 }
 0x6ed   :  { %3104 = vmatmul.mubr.msk.f32.vlgmr.msra.gmra.mrb[2].mxu1 %vm416_vm8, %v439_v39 }
 0x6ee   :  { %3110 = vmatprep.mubr.msk.f32.mxu1 %vm328_vm3, %v530_v40 }
 0x6f1   :  { %3358 = vmatpush3.bf16.xpose.msk.msra.mxu1 %vm3960_vm4, %v3353_v35 }
 0x6f8   :  { %3111 = vmatmul.mubr.msk.f32.vlgmr.msra.gmra.mrb[4].mxu1 %vm328_vm3, %v532_v41 }
 0x7c0   :  { %v4014_v42 = vpop.f32.mrb[2].mxu1 }
 0x7c1   :  { %v4016_v43 = vpop.f32.mrb[3].mxu1 }
 0x7cb   :  { %v3112_v44 = vpop.f32.mrb[4].mxu1 }
 0x7cc   :  { %v621_v45 = vmul.f32 0.35355338, %v3112_v44  ;;  %v611_v46 = vpop.f32.mrb[5].mxu1 }
 0x7cd   :  { %v620_v47 = vmul.f32 0.35355338, %v611_v46 }
 0x7ce   :  { %v623_v48 = vsel %vm193_vm5, %v621_v45, -1e+30 }
 0x7cf   :  { %v627_v49 = vsel %vm420_vm6, %v623_v48, -inf  ;;  %v622_v50 = vsel %vm192_vm7, %v620_v47, -1e+30 }
 0x7d0   :  { %628 = vmax.xlane.f32.xlu0 %v627_v49  ;;  %v624_v53 = vsel %vm416_vm8, %v622_v50, -inf }
 0x7d1   :  { %625 = vmax.xlane.f32.xlu1 %v624_v53 }
 0x7e2   :  { %3542 = vrot.lane.b32.xlu1 %v3954_v57, %s3717_s1 }
 0x7e6   :  { %734 = vrot.lane.b32.xlu1 %v3948_v56, %s3718_s29 }
 0x7ea   :  { %736 = vrot.lane.b32.xlu1 %v3945_v54, %s3718_s29 }
 0x85d   :  { %v629_v55 = vpop.xlane.xlu0 %628 }
 0x85e   :  { %v631_v58 = vsub.f32 %v623_v48, %v629_v55  ;;  %v626_v59 = vpop.xlane.xlu1 %625 }
 0x85f   :  { %v630_v60 = vsub.f32 %v622_v50, %v626_v59 }
 0x860   :  { %v634_v62 = vmul.f32 1.442695, %v631_v58 }
 0x861   :  { %v632_v1 = vmul.f32 1.442695, %v630_v60 }
 0x862   :  { %3622 = vpow2.f32 %v634_v62  ;;  %v3543_v2 = vpop.permute.xlu1 %3542 }
 0x863   :  { %v3545_v3 = vunpack.i.h.bf16 %v3543_v2  ;;  %v3544_v4 = vunpack.i.l.bf16 %v3543_v2  ;;  %3624 = vpow2.f32 %v632_v1 }
 0x865   :  { %v3359_v5 = vpack.c.bf16 %v3545_v3, %v3544_v4 }
 0x866   :  { %v735_v22 = vpop.permute.xlu1 %734 }
 0x867   :  { %3361 = vmatprep.subr.msk.bf16.mxu1 %vm3998_vm11, %v3359_v5 }
 0x868   :  { %3364 = vmatpush3.bf16.msk.msra.mxu1 %vm3998_vm11, %v3359_v5 }
 0x86a   :  { %v737_v23 = vpop.permute.xlu1 %736 }
 0x86c   :  { %v3623_v6 = vpop.eup %3622 }
 0x86d   :  { %v639_v7 = vsel %vm420_vm6, %v3623_v6, 0.0  ;;  %v3625_v8 = vpop.eup %3624 }
 0x86e   :  { %640 = vadd.xlane.f32.xlu0 %v639_v7  ;;  %v636_v9 = vsel %vm416_vm8, %v3625_v8, 0.0 }
 0x872   :  { %637 = vadd.xlane.f32.xlu0 %v636_v9 }
 0x888   :  { %3547 = vrot.lane.b32.xlu0 %v3954_v57, %s3719_s30 }
 0x8fb   :  { %v641_v11 = vpop.xlane.xlu0 %640 }
 0x8fc   :  { %3626 = vrcp.f32 %v641_v11 }
 0x8ff   :  { %v638_v12 = vpop.xlane.xlu0 %637 }
 0x900   :  { %3628 = vrcp.f32 %v638_v12 }
 0x903   :  { %v3548_v14 = vpop.permute.xlu0 %3547 }
 0x904   :  { %v3550_v15 = vunpack.i.h.bf16 %v3548_v14  ;;  %v3549_v16 = vunpack.i.l.bf16 %v3548_v14 }
 0x906   :  { %v3365_v17 = vpack.c.bf16 %v3550_v15, %v3549_v16  ;;  %v3627_v18 = vpop.eup %3626 }
 0x907   :  { %v645_v21 = vmul.f32 %v3627_v18, %v3623_v6 }
 0x908   :  { %3367 = vmatprep.subr.msk.bf16.mxu1 %vm3960_vm4, %v3365_v17 }
 0x90a   :  { %v3629_v19 = vpop.eup %3628 }
 0x90b   :  { %v644_v20 = vmul.f32 %v3629_v19, %v3625_v8 }
 0x90d   :  { %3117 = vmatprep.mubr.msk.f32.mxu1 %vm416_vm8, %v644_v20 }
 0x90e   :  { %3118 = vmatmul.mubr.msk.f32.vlgmr.msra.gmra.mrb[6].mxu1 %vm416_vm8, %v645_v21 }
 0x90f   :  { %3370 = vmatpush3.bf16.xpose.msk.msra.mxu1 %vm3960_vm4, %v3365_v17  ;;  %3124 = vmatprep.mubr.msk.f32.mxu1 %vm328_vm3, %v735_v22 }
 0x916   :  { %3125 = vmatmul.mubr.msk.f32.vlgmr.msra.gmra.mrb[8].mxu1 %vm328_vm3, %v737_v23 }
 0x9e1   :  { %v4046_v24 = vpop.f32.mrb[6].mxu1 }
 0x9e2   :  { %v4048_v25 = vpop.f32.mrb[7].mxu1 }
 0x9e9   :  { %v3126_v30 = vpop.f32.mrb[8].mxu1 }
 0x9ea   :  { %v826_v31 = vmul.f32 0.35355338, %v3126_v30  ;;  %v816_v32 = vpop.f32.mrb[9].mxu1 }
 0x9eb   :  { %v825_v34 = vmul.f32 0.35355338, %v816_v32 }
 0x9ec   :  { %v828_v35 = vsel %vm193_vm5, %v826_v31, -1e+30 }
 0x9ed   :  { %v832_v36 = vsel %vm420_vm6, %v828_v35, -inf  ;;  %v827_v37 = vsel %vm192_vm7, %v825_v34, -1e+30 }
 0x9ee   :  { %833 = vmax.xlane.f32.xlu0 %v832_v36  ;;  %v829_v38 = vsel %vm416_vm8, %v827_v37, -inf }
 0x9ef   :  { %830 = vmax.xlane.f32.xlu1 %v829_v38 }
 0xa00   :  { %3552 = vrot.lane.b32.xlu1 %v3954_v57, %s3720_s11 }
 0xa04   :  { %939 = vrot.lane.b32.xlu1 %v3948_v56, %s3721_s0 }
 0xa08   :  { %941 = vrot.lane.b32.xlu1 %v3945_v54, %s3721_s0 }
 0xa7b   :  { %v834_v39 = vpop.xlane.xlu0 %833 }
 0xa7c   :  { %v836_v40 = vsub.f32 %v828_v35, %v834_v39  ;;  %v831_v41 = vpop.xlane.xlu1 %830 }
 0xa7d   :  { %v835_v44 = vsub.f32 %v827_v37, %v831_v41 }
 0xa7e   :  { %v839_v45 = vmul.f32 1.442695, %v836_v40 }
 0xa7f   :  { %v837_v46 = vmul.f32 1.442695, %v835_v44 }
 0xa80   :  { %3630 = vpow2.f32 %v839_v45  ;;  %v3553_v47 = vpop.permute.xlu1 %3552 }
 0xa81   :  { %v3555_v48 = vunpack.i.h.bf16 %v3553_v47  ;;  %v3554_v49 = vunpack.i.l.bf16 %v3553_v47  ;;  %3632 = vpow2.f32 %v837_v46 }
 0xa83   :  { %v3371_v50 = vpack.c.bf16 %v3555_v48, %v3554_v49  ;;  %v1176_v48 = vld [vmem:[%s4484_s6] sm:$0xff]  ;;  %v1178_v49 = vld [vmem:[%s4484_s6 + $0x10] sm:$0xff] }
 0xa84   :  { %v940_v7 = vpop.permute.xlu1 %939 }
 0xa85   :  { %3373 = vmatprep.subr.msk.bf16.mxu1 %vm3998_vm11, %v3371_v50 }
 0xa86   :  { %3376 = vmatpush3.bf16.msk.msra.mxu1 %vm3998_vm11, %v3371_v50 }
 0xa88   :  { %v942_v8 = vpop.permute.xlu1 %941 }
 0xa8a   :  { %v3631_v56 = vpop.eup %3630 }
 0xa8b   :  { %v844_v54 = vsel %vm420_vm6, %v3631_v56, 0.0  ;;  %v3633_v53 = vpop.eup %3632 }
 0xa8c   :  { %845 = vadd.xlane.f32.xlu0 %v844_v54  ;;  %v841_v55 = vsel %vm416_vm8, %v3633_v53, 0.0 }
 0xa90   :  { %842 = vadd.xlane.f32.xlu0 %v841_v55 }
 0xaa6   :  { %3557 = vrot.lane.b32.xlu0 %v3954_v57, %s3722_s12 }
 0xb19   :  { %v846_v58 = vpop.xlane.xlu0 %845 }
 0xb1a   :  { %3634 = vrcp.f32 %v846_v58 }
 0xb1d   :  { %v843_v59 = vpop.xlane.xlu0 %842 }
 0xb1e   :  { %3636 = vrcp.f32 %v843_v59 }
 0xb21   :  { %v3558_v60 = vpop.permute.xlu0 %3557 }
 0xb22   :  { %v3560_v62 = vunpack.i.h.bf16 %v3558_v60  ;;  %v3559_v1 = vunpack.i.l.bf16 %v3558_v60 }
 0xb24   :  { %v3377_v2 = vpack.c.bf16 %v3560_v62, %v3559_v1  ;;  %v3635_v3 = vpop.eup %3634 }
 0xb25   :  { %v850_v6 = vmul.f32 %v3635_v3, %v3631_v56  ;;  %v1179_v56 = vld [vmem:[%s4484_s6 + $0x18] sm:$0xff] }
 0xb26   :  { %3379 = vmatprep.subr.msk.bf16.mxu1 %vm3960_vm4, %v3377_v2  ;;  %v3393_v54 = vpack.c.bf16 %v1179_v56, %v1178_v49 }
 0xb28   :  { %v3637_v4 = vpop.eup %3636 }
 0xb29   :  { %v849_v5 = vmul.f32 %v3637_v4, %v3633_v53 }
 0xb2b   :  { %3131 = vmatprep.mubr.msk.f32.mxu1 %vm416_vm8, %v849_v5 }
 0xb2c   :  { %3132 = vmatmul.mubr.msk.f32.vlgmr.msra.gmra.mrb[10].mxu1 %vm416_vm8, %v850_v6 }
 0xb2d   :  { %3382 = vmatpush3.bf16.xpose.msk.msra.mxu1 %vm3960_vm4, %v3377_v2  ;;  %3138 = vmatprep.mubr.msk.f32.mxu1 %vm328_vm3, %v940_v7 }
 0xb34   :  { %3139 = vmatmul.mubr.msk.f32.vlgmr.msra.gmra.mrb[12].mxu1 %vm328_vm3, %v942_v8 }
 0xbff   :  { %v3133_v9 = vpop.f32.mrb[10].mxu1 }
 0xc00   :  { %v930_v11 = vpop.f32.mrb[11].mxu1 }
 0xc07   :  { %v3140_v12 = vpop.f32.mrb[12].mxu1 }
 0xc08   :  { %v1031_v14 = vmul.f32 0.35355338, %v3140_v12  ;;  %v1021_v15 = vpop.f32.mrb[13].mxu1 }
 0xc09   :  { %v1030_v16 = vmul.f32 0.35355338, %v1021_v15 }
 0xc0a   :  { %v1033_v17 = vsel %vm193_vm5, %v1031_v14, -1e+30 }
 0xc0b   :  { %v1037_v18 = vsel %vm420_vm6, %v1033_v17, -inf  ;;  %v1032_v19 = vsel %vm192_vm7, %v1030_v16, -1e+30 }
 0xc0c   :  { %1038 = vmax.xlane.f32.xlu0 %v1037_v18  ;;  %v1034_v20 = vsel %vm416_vm8, %v1032_v19, -inf }
 0xc0d   :  { %1035 = vmax.xlane.f32.xlu1 %v1034_v20 }
 0xc1e   :  { %3562 = vrot.lane.b32.xlu1 %v3954_v57, %s3723_s2 }
 0xc22   :  { %1148 = vrot.lane.b32.xlu1 %v4046_v24, %s3724_s14 }
 0xc26   :  { %1154 = vrot.lane.b32.xlu1 %v930_v11, %s3725_s15 }
 0xc2a   :  { %1156 = vrot.lane.b32.xlu1 %v3133_v9, %s3725_s15 }
 0xc99   :  { %v1039_v21 = vpop.xlane.xlu0 %1038 }
 0xc9a   :  { %v1041_v22 = vsub.f32 %v1033_v17, %v1039_v21  ;;  %v1036_v23 = vpop.xlane.xlu1 %1035 }
 0xc9b   :  { %v1040_v30 = vsub.f32 %v1032_v19, %v1036_v23 }
 0xc9c   :  { %v1044_v31 = vmul.f32 1.442695, %v1041_v22 }
 0xc9d   :  { %v1042_v32 = vmul.f32 1.442695, %v1040_v30 }
 0xc9e   :  { %v3563_v34 = vpop.permute.xlu1 %3562 }
 0xc9f   :  { %3638 = vpow2.f32 %v1042_v32  ;;  %v3565_v35 = vunpack.i.h.bf16 %v3563_v34  ;;  %v3564_v36 = vunpack.i.l.bf16 %v3563_v34  ;;  %v1306_v32 = vld [vmem:[%s4485_s7 + $0x8] sm:$0xff] }
 0xca0   :  { %3640 = vpow2.f32 %v1044_v31  ;;  %v1305_v31 = vld [vmem:[%s4485_s7] sm:$0xff] }
 0xca1   :  { %v3383_v57 = vpack.c.bf16 %v3565_v35, %v3564_v36  ;;  %v3397_v34 = vpack.c.bf16 %v1306_v32, %v1305_v31  ;;  %v1307_v35 = vld [vmem:[%s4485_s7 + $0x10] sm:$0xff]  ;;  %v1308_v36 = vld [vmem:[%s4485_s7 + $0x18] sm:$0xff] }
 0xca2   :  { %v1149_v58 = vpop.permute.xlu1 %1148 }
 0xca3   :  { %3385 = vmatprep.subr.msk.bf16.mxu0 %vm3998_vm11, %v3383_v57  ;;  %v1169_v3 = vsel %vm328_vm3, %v4014_v42, %v1149_v58 }
 0xca4   :  { %3388 = vmatpush3.bf16.msk.msra.mxu0 %vm3998_vm11, %v3383_v57  ;;  %v1311_v57 = vsub.s32 2, %v3907_v26 }
 0xca5   :  { %3398 = vmatprep.subr.bf16.mxu0 %v3397_v34 }
 0xca6   :  { %v1155_v59 = vpop.permute.xlu1 %1154 }
 0xca9   :  { %v3639_v24 = vpop.eup %3638 }
 0xcaa   :  { %v1046_v37 = vsel %vm416_vm8, %v3639_v24, 0.0  ;;  %v3641_v38 = vpop.eup %3640  ;;  %v1157_v62 = vpop.permute.xlu1 %1156 }
 0xcab   :  { %1047 = vadd.xlane.f32.xlu0 %v1046_v37  ;;  %v1049_v39 = vsel %vm420_vm6, %v3641_v38, 0.0  ;;  %v1172_v6 = vsel %vm1170_vm12, %v1169_v3, %v1157_v62 }
 0xcaf   :  { %1050 = vadd.xlane.f32.xlu0 %v1049_v39 }
 0xcc5   :  { %1146 = vrot.lane.b32.xlu0 %v4048_v25, %s3724_s14  ;;  %v1177_v25 = vld [vmem:[%s4484_s6 + $0x8] sm:$0xff] }
 0xcc6   :  { %v3389_v50 = vpack.c.bf16 %v1177_v25, %v1176_v48 }
 0xcc8   :  { %3390 = vmatprep.subr.bf16.mxu1 %v3389_v50 }
 0xcc9   :  { %3392 = vmatpush3.bf16.msra.mxu1 %v3389_v50 }
 0xcca   :  { %3394 = vmatprep.subr.bf16.mxu1 %v3393_v54 }
 0xccd   :  { %3396 = vmatpush3.bf16.msra.mxu1 %v3393_v54 }
 0xd38   :  { %v1048_v40 = vpop.xlane.xlu0 %1047 }
 0xd39   :  { %3642 = vrcp.f32 %v1048_v40 }
 0xd3c   :  { %v1051_v41 = vpop.xlane.xlu0 %1050 }
 0xd3d   :  { %3644 = vrcp.f32 %v1051_v41 }
 0xd40   :  { %v1147_v60 = vpop.permute.xlu0 %1146 }
 0xd41   :  { %v1168_v1 = vsel %vm328_vm3, %v4016_v43, %v1147_v60  ;;  %v1413_v60 = vld [vmem:[%s4486_s8 + $0x18] sm:$0xff] }
 0xd42   :  { %v1171_v4 = vsel %vm1170_vm12, %v1168_v1, %v1155_v59  ;;  %v1412_v59 = vld [vmem:[%s4486_s8 + $0x10] sm:$0xff]  ;;  %v1414_v1 = vld [vmem:[%s4486_s8 + $0x20] sm:$0xff] }
 0xd43   :  { %v3643_v44 = vpop.eup %3642  ;;  %v3409_v62 = vpack.c.bf16 %v1413_v60, %v1412_v59 }
 0xd44   :  { %v1054_v45 = vmul.f32 %v3643_v44, %v3639_v24  ;;  %v1312_v24 = vrot.slane %v3913_v28, %v1311_v57 }
 0xd46   :  { %3145 = vmatprep.mubr.msk.f32.mxu0 %vm416_vm8, %v1054_v45 }
 0xd47   :  { %v3645_v46 = vpop.eup %3644 }
 0xd48   :  { %v1055_v47 = vmul.f32 %v3645_v46, %v3641_v38 }
 0xd4a   :  { %3146 = vmatmul.mubr.msk.f32.vlgmr.msra.gmra.mrb[6].mxu0 %vm416_vm8, %v1055_v47 }
 0xd4b   :  { %3400 = vmatpush3.bf16.msra.mxu0 %v3397_v34 }
 0xe1d   :  { %v3147_v53 = vpop.f32.mrb[6].mxu0 }
 0xe1e   :  { %1164 = vrot.lane.b32.xlu1 %v3147_v53, %s3726_s24  ;;  %v1135_v55 = vpop.f32.mrb[7].mxu0  ;;  %v1410_v53 = vld [vmem:[%s4486_s8] sm:$0xff] }
 0xe1f   :  { %1162 = vrot.lane.b32.xlu0 %v1135_v55, %s3726_s24  ;;  %v1411_v55 = vld [vmem:[%s4486_s8 + $0x8] sm:$0xff] }
 0xe20   :  { %v3405_v58 = vpack.c.bf16 %v1411_v55, %v1410_v53 }
 0xe22   :  { %3406 = vmatprep.subr.bf16.mxu1 %v3405_v58 }
 0xe23   :  { %1264 = vrot.lane.b32.xlu0 %v3942_v52, %s3727_s25 }
 0xe90   :  { %v1165_v2 = vpop.permute.xlu1 %1164 }
 0xe91   :  { %v1163_v5 = vpop.permute.xlu0 %1162  ;;  %v1175_v7 = vsel %vm1173_vm13, %v1172_v6, %v1165_v2  ;;  %v1415_v2 = vld [vmem:[%s4486_s8 + $0x28] sm:$0xff] }
 0xe92   :  { %v1174_v52 = vsel %vm1173_vm13, %v1171_v4, %v1163_v5  ;;  %v3413_v3 = vpack.c.bf16 %v1415_v2, %v1414_v1  ;;  %v1416_v4 = vld [vmem:[%s4486_s8 + $0x30] sm:$0xff]  ;;  %v1417_v5 = vld [vmem:[%s4486_s8 + $0x38] sm:$0xff] }
 0xe93   :  { %3156 = vmatprep.mubr.msk.f32.mxu1 %vm148_vm1, %v1174_v52  ;;  %v3417_v6 = vpack.c.bf16 %v1417_v5, %v1416_v4 }
 0xe94   :  { %3157 = vmatmul.mubr.msk.f32.vlgmr.msra.gmra.mrb[14].mxu1 %vm148_vm1, %v1175_v7 }
 0xe95   :  { %v1265_v8 = vpop.permute.xlu0 %1264  ;;  %3408 = vmatpush3.bf16.msra.mxu1 %v3405_v58 }
 0xe96   :  { %3410 = vmatprep.subr.bf16.mxu1 %v3409_v62 }
 0xe99   :  { %3412 = vmatpush3.bf16.msra.mxu1 %v3409_v62 }
 0xe9a   :  { %3414 = vmatprep.subr.bf16.mxu1 %v3413_v3 }
 0xe9d   :  { %3416 = vmatpush3.bf16.msra.mxu1 %v3413_v3 }
 0xe9e   :  { %3418 = vmatprep.subr.bf16.mxu1 %v3417_v6 }
 0xea1   :  { %3420 = vmatpush3.bf16.msra.mxu1 %v3417_v6 }
 0xf67   :  { %v3158_v43 = vpop.f32.mrb[14].mxu1 }
 0xf68   :  { %v1262_v9 = vadd.f32 %v3158_v43, %v3899_v13  ;;  %v1252_v11 = vpop.f32.mrb[15].mxu1 }
 0xf69   :  { %v1261_v42 = vadd.f32 %v1252_v11, %v3895_v10 }
 0xf6a   :  { %v4128_v12 = vadd.f32 %v1265_v8, %v1262_v9 }
 0xf6b   :  { %v4130_v14 = vadd.f32 %v1265_v8, %v1261_v42 }
 0xf6c   :  { %v1272_v15 = vsel %vm152_vm2, %v4128_v12, 0.0 }
 0xf6d   :  { %1273 = vadd.xlane.f32.xlu0 %v1272_v15  ;;  %v1269_v16 = vsel %vm148_vm1, %v4130_v14, 0.0 }
 0xf6e   :  { %1270 = vadd.xlane.f32.xlu1 %v1269_v16 }
 0xf7f   :  { %1295 = vrot.lane.b32.xlu1 %v3918_v29, %s3715_s28 }
 0xf83   :  { %1502 = vrot.lane.b32.xlu1 %v1312_v24, %s3715_s28 }
 0xffa   :  { %v1274_v17 = vpop.xlane.xlu0 %1273 }
 0xffb   :  { %v1276_v13 = vmul.f32 0.03125, %v1274_v17  ;;  %v1271_v18 = vpop.xlane.xlu1 %1270 }
 0xffc   :  { %v1275_v19 = vmul.f32 0.03125, %v1271_v18 }
 0xffd   :  { %v1278_v10 = vsub.f32 %v4128_v12, %v1276_v13 }
 0xffe   :  { %v1277_v20 = vsub.f32 %v4130_v14, %v1275_v19 }
 0xfff   :  { %v1280_v23 = vmul.f32 %v1278_v10, %v1278_v10  ;;  %v1296_v46 = vpop.permute.xlu1 %1295 }
0x1000   :  { %v1279_v21 = vmul.f32 %v1277_v20, %v1277_v20 }
0x1001   :  { %v1284_v30 = vsel %vm152_vm2, %v1280_v23, 0.0 }
0x1002   :  { %v1281_v22 = vsel %vm148_vm1, %v1279_v21, 0.0 }
0x1003   :  { %1282 = vadd.xlane.f32.xlu0 %v1281_v22  ;;  %v1503_v23 = vpop.permute.xlu1 %1502 }
0x1007   :  { %1285 = vadd.xlane.f32.xlu0 %v1284_v30 }
0x101d   :  { %1300 = vrot.lane.b32.xlu0 %v3918_v29, %s3727_s25  ;;  %v3401_v29 = vpack.c.bf16 %v1308_v36, %v1307_v35 }
0x101f   :  { %3402 = vmatprep.subr.bf16.mxu0 %v3401_v29 }
0x1020   :  { %3404 = vmatpush3.bf16.msra.mxu0 %v3401_v29 }
0x1090   :  { %v1283_v37 = vpop.xlane.xlu0 %1282 }
0x1091   :  { %v1287_v38 = vmul.f32 0.03125, %v1283_v37 }
0x1093   :  { %v1289_v39 = vadd.f32 1e-05, %v1287_v38 }
0x1094   :  { %v1286_v40 = vpop.xlane.xlu0 %1285 }
0x1095   :  { %3646 = vrsqrt.f32 %v1289_v39  ;;  %v1288_v41 = vmul.f32 0.03125, %v1286_v40 }
0x1097   :  { %v1290_v44 = vadd.f32 1e-05, %v1288_v41 }
0x1098   :  { %v1301_v48 = vpop.permute.xlu0 %1300 }
0x1099   :  { %3648 = vrsqrt.f32 %v1290_v44 }
0x109f   :  { %v3647_v45 = vpop.eup %3646 }
0x10a0   :  { %v1293_v47 = vmul.f32 %v3647_v45, %v1277_v20 }
0x10a2   :  { %v1298_v25 = vmul.f32 %v1296_v46, %v1293_v47 }
0x10a3   :  { %v3649_v49 = vpop.eup %3648 }
0x10a4   :  { %v1294_v50 = vmul.f32 %v3649_v49, %v1278_v10  ;;  %v1303_v56 = vadd.f32 %v1301_v48, %v1298_v25  ;;  %v2904_v25 = vld [vmem:[%s4482_s5 + $0x28] sm:$0xff] }
0x10a6   :  { %v1299_v54 = vmul.f32 %v1296_v46, %v1294_v50  ;;  %3167 = vmatprep.mubr.msk.f32.mxu0 %vm148_vm1, %v1303_v56  ;;  %v4206_v46 = vld [vmem:[%s4481_s9 + $0x4] sm:$0x7]  ;;  %v2905_v50 = vld [vmem:[%s4482_s5 + $0x30] sm:$0xff] }
0x10a7   :  { %v4211_v47 = vrot.slane %v4206_v46, %v223_v27  ;;  %v2906_v27 = vld [vmem:[%s4482_s5 + $0x38] sm:$0xff] }
0x10a8   :  { %v1304_v28 = vadd.f32 %v1301_v48, %v1299_v54  ;;  %v2903_v48 = vld [vmem:[%s4482_s5 + $0x20] sm:$0xff]  ;;  %v3425_v56 = vpack.c.bf16 %v2906_v27, %v2905_v50 }
0x10a9   :  { %v3421_v49 = vpack.c.bf16 %v2904_v25, %v2903_v48 }
0x10aa   :  { %3168 = vmatmul.mubr.msk.f32.vlgmr.msra.gmra.mrb[8].mxu0 %vm148_vm1, %v1304_v28 }
0x10ab   :  { %3422 = vmatprep.subr.bf16.mxu0 %v3421_v49 }
0x10ac   :  { %3424 = vmatpush3.bf16.msra.mxu0 %v3421_v49 }
0x10ad   :  { %3426 = vmatprep.subr.bf16.mxu0 %v3425_v56 }
0x10b0   :  { %3428 = vmatpush3.bf16.msra.mxu0 %v3425_v56 }
0x117d   :  { %v3169_v52 = vpop.f32.mrb[8].mxu0 }
0x117e   :  { %v1391_v7 = vadd.f32 %v3169_v52, %v1312_v24  ;;  %v1385_v43 = vpop.f32.mrb[9].mxu0 }
0x117f   :  { %v1386_v8 = vadd.f32 %v1385_v43, %v1312_v24 }
0x1180   :  { %v2899_v9 = vmul.f32 -1.702, %v1391_v7 }
0x1181   :  { %v2898_v11 = vmul.f32 -1.702, %v1386_v8 }
0x1182   :  { %v1400_v42 = vmul.f32 1.442695, %v2899_v9 }
0x1183   :  { %v1398_v15 = vmul.f32 1.442695, %v2898_v11 }
0x1184   :  { %3650 = vpow2.f32 %v1400_v42 }
0x1185   :  { %3652 = vpow2.f32 %v1398_v15 }
0x118e   :  { %v3651_v16 = vpop.eup %3650 }
0x118f   :  { %v3653_v17 = vpop.eup %3652  ;;  %v1403_v13 = vadd.f32 1.0, %v3651_v16 }
0x1190   :  { %v1402_v18 = vadd.f32 1.0, %v3653_v17 }
0x1191   :  { %3654 = vrcp.f32 %v1403_v13 }
0x1192   :  { %3656 = vrcp.f32 %v1402_v18 }
0x119b   :  { %v3655_v19 = vpop.eup %3654 }
0x119c   :  { %v3657_v10 = vpop.eup %3656  ;;  %v1409_v21 = vmul.f32 %v3655_v19, %v1391_v7  ;;  %v4234_v7 = vrot.slane %v4206_v46, %v239_v51 }
0x119d   :  { %v1408_v20 = vmul.f32 %v3657_v10, %v1386_v8 }
0x119f   :  { %3186 = vmatprep.mubr.msk.f32.mxu1 %vm65_vm0, %v1408_v20 }
0x11a0   :  { %3187 = vmatmul.mubr.msk.f32.vlgmr.msra.gmra.mrb[16].mxu1 %vm65_vm0, %v1409_v21 }
0x1273   :  { %v3188_v22 = vpop.f32.mrb[16].mxu1 }
0x1274   :  { %v1500_v30 = vadd.f32 %v3188_v22, %v4128_v12  ;;  %v1490_v31 = vpop.f32.mrb[17].mxu1 }
0x1275   :  { %v1499_v32 = vadd.f32 %v1490_v31, %v4130_v14 }
0x1276   :  { %v4191_v34 = vadd.f32 %v1503_v23, %v1500_v30 }
0x1277   :  { %v4193_v35 = vadd.f32 %v1503_v23, %v1499_v32 }
0x1278   :  { %v1512_v36 = vsel %vm152_vm2, %v4191_v34, 0.0 }
0x1279   :  { %1513 = vadd.xlane.f32.xlu0 %v1512_v36  ;;  %v1509_v29 = vsel %vm148_vm1, %v4193_v35, 0.0 }
0x127a   :  { %1510 = vadd.xlane.f32.xlu1 %v1509_v29 }
0x1306   :  { %v1514_v24 = vpop.xlane.xlu0 %1513 }
0x1307   :  { %v1516_v37 = vmul.f32 0.03125, %v1514_v24  ;;  %v1511_v38 = vpop.xlane.xlu1 %1510 }
0x1308   :  { %v1515_v39 = vmul.f32 0.03125, %v1511_v38 }
0x1309   :  { %v1518_v12 = vsub.f32 %v4191_v34, %v1516_v37 }
0x130a   :  { %v1517_v14 = vsub.f32 %v4193_v35, %v1515_v39 }
0x130b   :  { %v1520_v40 = vmul.f32 %v1518_v12, %v1518_v12 }
0x130c   :  { %v1519_v41 = vmul.f32 %v1517_v14, %v1517_v14 }
0x130d   :  { %v1524_v44 = vsel %vm152_vm2, %v1520_v40, 0.0 }
0x130e   :  { %1525 = vadd.xlane.f32.xlu1 %v1524_v44  ;;  %v1521_v45 = vsel %vm148_vm1, %v1519_v41, 0.0 }
0x130f   :  { %1522 = vadd.xlane.f32.xlu0 %v1521_v45 }
0x1325   :  { %1542 = vrot.lane.b32.xlu0 %v4211_v47, %s3712_s13 }
0x139b   :  { %v1526_v54 = vpop.xlane.xlu1 %1525 }
0x139c   :  { %v1528_v28 = vmul.f32 0.03125, %v1526_v54  ;;  %v1523_v53 = vpop.xlane.xlu0 %1522 }
0x139d   :  { %v1527_v55 = vmul.f32 0.03125, %v1523_v53 }
0x139e   :  { %v1530_v58 = vadd.f32 1e-05, %v1528_v28 }
0x139f   :  { %v1529_v59 = vadd.f32 1e-05, %v1527_v55 }
0x13a0   :  { %3658 = vrsqrt.f32 %v1530_v58  ;;  %v1543_v3 = vpop.permute.xlu0 %1542 }
0x13a1   :  { %3660 = vrsqrt.f32 %v1529_v59 }
0x13aa   :  { %v3659_v60 = vpop.eup %3658 }
0x13ab   :  { %v3661_v62 = vpop.eup %3660  ;;  %v1534_v1 = vmul.f32 %v3659_v60, %v1518_v12 }
0x13ac   :  { %v1533_v2 = vmul.f32 %v3661_v62, %v1517_v14 }
0x13ad   :  { %v1540_v4 = vmul.f32 %v4211_v47, %v1534_v1 }
0x13ae   :  { %v1539_v5 = vmul.f32 %v4211_v47, %v1533_v2 }
0x13af   :  { %v1546_v52 = vadd.f32 %v1543_v3, %v1540_v4 }
0x13b0   :  { %v1545_v6 = vadd.f32 %v1543_v3, %v1539_v5 }
0x13b2   :  { %3197 = vmatprep.mubr.msk.f32.mxu0 %vm148_vm1, %v1545_v6 }
0x13b3   :  { %3198 = vmatmul.mubr.msk.f32.vlgmr.msra.gmra.mrb[10].mxu0 %vm148_vm1, %v1546_v52 }
0x1486   :  { %v3199_v43 = vpop.f32.mrb[10].mxu0 }
0x1487   :  { %v4237_v8 = vadd.f32 %v3199_v43, %v4234_v7  ;;  %v1628_v9 = vpop.f32.mrb[11].mxu0 }
0x1488   :  { %v4240_v11 = vadd.f32 %v1628_v9, %v4234_v7 }
0x1489   :  { %1842 = vrot.lane.b32.xlu0 %v4237_v8, %s3714_s27 }
0x148a   :  { %3204 = vmatprep.mubr.msk.f32.mxu0 %vm328_vm3, %v4240_v11  ;;  %v4248_v42 = vpack.i.bf16 %v4237_v8, %v4240_v11 }
0x148c   :  { %3567 = vrot.lane.b32.xlu1 %v4248_v42, %s3712_s13 }
0x1490   :  { %3572 = vrot.lane.b32.xlu1 %v4248_v42, %s3713_s3 }
0x1494   :  { %1840 = vrot.lane.b32.xlu1 %v4240_v11, %s3714_s27 }
0x14fb   :  { %v1843_v21 = vpop.permute.xlu0 %1842 }
0x14fe   :  { %v3568_v51 = vpop.permute.xlu1 %3567 }
0x14ff   :  { %v3570_v15 = vunpack.i.h.bf16 %v3568_v51  ;;  %v3569_v16 = vunpack.i.l.bf16 %v3568_v51 }
0x1501   :  { %v3429_v17 = vpack.c.bf16 %v3570_v15, %v3569_v16 }
0x1502   :  { %v3573_v13 = vpop.permute.xlu1 %3572 }
0x1503   :  { %v3575_v18 = vunpack.i.h.bf16 %v3573_v13  ;;  %v3574_v19 = vunpack.i.l.bf16 %v3573_v13  ;;  %3431 = vmatprep.subr.msk.bf16.mxu0 %vm3960_vm4, %v3429_v17 }
0x1504   :  { %3434 = vmatpush3.bf16.xpose.msk.msra.mxu0 %vm3960_vm4, %v3429_v17 }
0x1505   :  { %v3441_v10 = vpack.c.bf16 %v3575_v18, %v3574_v19 }
0x1506   :  { %v1841_v20 = vpop.permute.xlu1 %1840 }
0x1507   :  { %3443 = vmatprep.subr.msk.bf16.mxu0 %vm3960_vm4, %v3441_v10 }
0x150b   :  { %3205 = vmatmul.mubr.msk.f32.vlgmr.msra.gmra.mrb[12].mxu0 %vm328_vm3, %v4237_v8 }
0x150c   :  { %3446 = vmatpush3.bf16.xpose.msk.msra.mxu0 %vm3960_vm4, %v3441_v10  ;;  %3218 = vmatprep.mubr.msk.f32.mxu0 %vm328_vm3, %v1841_v20 }
0x1513   :  { %3219 = vmatmul.mubr.msk.f32.vlgmr.msra.gmra.mrb[14].mxu0 %vm328_vm3, %v1843_v21 }
0x15de   :  { %v3206_v22 = vpop.f32.mrb[12].mxu0 }
0x15df   :  { %v1727_v23 = vmul.f32 0.35355338, %v3206_v22  ;;  %v1717_v30 = vpop.f32.mrb[13].mxu0 }
0x15e0   :  { %v1726_v31 = vmul.f32 0.35355338, %v1717_v30 }
0x15e1   :  { %v1729_v32 = vsel %vm193_vm5, %v1727_v23, -1e+30 }
0x15e2   :  { %v1733_v36 = vsel %vm420_vm6, %v1729_v32, -inf  ;;  %v1728_v29 = vsel %vm192_vm7, %v1726_v31, -1e+30 }
0x15e3   :  { %1734 = vmax.xlane.f32.xlu0 %v1733_v36  ;;  %v1730_v24 = vsel %vm416_vm8, %v1728_v29, -inf }
0x15e4   :  { %1731 = vmax.xlane.f32.xlu1 %v1730_v24 }
0x15e6   :  { %v3220_v37 = vpop.f32.mrb[14].mxu0 }
0x15e7   :  { %v1922_v38 = vpop.f32.mrb[15].mxu0  ;;  %v1932_v39 = vmul.f32 0.35355338, %v3220_v37 }
0x15e8   :  { %v1931_v12 = vmul.f32 0.35355338, %v1922_v38 }
0x15e9   :  { %v1934_v41 = vsel %vm193_vm5, %v1932_v39, -1e+30 }
0x15ea   :  { %v1933_v14 = vsel %vm192_vm7, %v1931_v12, -1e+30  ;;  %v1938_v44 = vsel %vm420_vm6, %v1934_v41, -inf }
0x15eb   :  { %v1935_v40 = vsel %vm416_vm8, %v1933_v14, -inf }
0x15ec   :  { %1936 = vmax.xlane.f32.xlu0 %v1935_v40 }
0x15f0   :  { %1939 = vmax.xlane.f32.xlu0 %v1938_v44 }
0x15f5   :  { %3577 = vrot.lane.b32.xlu1 %v4248_v42, %s3715_s28 }
0x1670   :  { %v1735_v45 = vpop.xlane.xlu0 %1734 }
0x1671   :  { %v1737_v48 = vsub.f32 %v1729_v32, %v1735_v45  ;;  %v1732_v25 = vpop.xlane.xlu1 %1731 }
0x1672   :  { %v1736_v49 = vsub.f32 %v1728_v29, %v1732_v25 }
0x1673   :  { %v1740_v50 = vmul.f32 1.442695, %v1737_v48 }
0x1674   :  { %v1738_v27 = vmul.f32 1.442695, %v1736_v49 }
0x1675   :  { %3662 = vpow2.f32 %v1740_v50  ;;  %v3578_v56 = vpop.permute.xlu1 %3577 }
0x1676   :  { %3664 = vpow2.f32 %v1738_v27  ;;  %v3580_v54 = vunpack.i.h.bf16 %v3578_v56  ;;  %v3579_v28 = vunpack.i.l.bf16 %v3578_v56 }
0x1678   :  { %v3435_v53 = vpack.c.bf16 %v3580_v54, %v3579_v28 }
0x1679   :  { %v1937_v55 = vpop.xlane.xlu0 %1936 }
0x167a   :  { %3437 = vmatprep.subr.msk.bf16.mxu1 %vm3998_vm11, %v3435_v53  ;;  %v1941_v6 = vsub.f32 %v1933_v14, %v1937_v55 }
0x167b   :  { %3440 = vmatpush3.bf16.msk.msra.mxu1 %vm3998_vm11, %v3435_v53 }
0x167c   :  { %v1943_v52 = vmul.f32 1.442695, %v1941_v6 }
0x167d   :  { %v1940_v58 = vpop.xlane.xlu0 %1939 }
0x167e   :  { %v1942_v59 = vsub.f32 %v1934_v41, %v1940_v58 }
0x167f   :  { %v3663_v60 = vpop.eup %3662 }
0x1680   :  { %v3665_v62 = vpop.eup %3664  ;;  %v1945_v1 = vmul.f32 1.442695, %v1942_v59  ;;  %v1745_v2 = vsel %vm420_vm6, %v3663_v60, 0.0 }
0x1681   :  { %1746 = vadd.xlane.f32.xlu0 %v1745_v2  ;;  %v1742_v3 = vsel %vm416_vm8, %v3665_v62, 0.0 }
0x1682   :  { %3666 = vpow2.f32 %v1945_v1  ;;  %1743 = vadd.xlane.f32.xlu1 %v1742_v3 }
0x1683   :  { %3668 = vpow2.f32 %v1943_v52 }
0x168c   :  { %v3667_v4 = vpop.eup %3666 }
0x168d   :  { %v1950_v5 = vsel %vm420_vm6, %v3667_v4, 0.0  ;;  %v3669_v43 = vpop.eup %3668 }
0x168e   :  { %1951 = vadd.xlane.f32.xlu0 %v1950_v5  ;;  %v1947_v9 = vsel %vm416_vm8, %v3669_v43, 0.0 }
0x1693   :  { %3587 = vrot.lane.b32.xlu1 %v4248_v42, %s3719_s30 }
0x1697   :  { %2045 = vrot.lane.b32.xlu1 %v4240_v11, %s3718_s29 }
0x16a4   :  { %3582 = vrot.lane.b32.xlu0 %v4248_v42, %s3717_s1 }
0x16bb   :  { %1948 = vadd.xlane.f32.xlu1 %v1947_v9 }
0x16cc   :  { %2047 = vrot.lane.b32.xlu1 %v4237_v8, %s3718_s29 }
0x170e   :  { %v1747_v51 = vpop.xlane.xlu0 %1746 }
0x170f   :  { %3670 = vrcp.f32 %v1747_v51  ;;  %v1744_v15 = vpop.xlane.xlu1 %1743 }
0x1710   :  { %3672 = vrcp.f32 %v1744_v15 }
0x1713   :  { %v3588_v10 = vpop.permute.xlu1 %3587 }
0x1714   :  { %v3590_v21 = vunpack.i.h.bf16 %v3588_v10  ;;  %v3589_v22 = vunpack.i.l.bf16 %v3588_v10 }
0x1716   :  { %v3453_v32 = vpack.c.bf16 %v3590_v21, %v3589_v22 }
0x1717   :  { %v2046_v36 = vpop.permute.xlu1 %2045 }
0x1719   :  { %v3671_v16 = vpop.eup %3670 }
0x171a   :  { %v3673_v17 = vpop.eup %3672  ;;  %v1751_v19 = vmul.f32 %v3671_v16, %v3663_v60 }
0x171b   :  { %v1952_v13 = vpop.xlane.xlu0 %1951  ;;  %v1750_v18 = vmul.f32 %v3673_v17, %v3665_v62 }
0x171c   :  { %3674 = vrcp.f32 %v1952_v13 }
0x171d   :  { %3211 = vmatprep.mubr.msk.f32.mxu1 %vm416_vm8, %v1750_v18 }
0x171e   :  { %3212 = vmatmul.mubr.msk.f32.vlgmr.msra.gmra.mrb[18].mxu1 %vm416_vm8, %v1751_v19 }
0x171f   :  { %v3583_v20 = vpop.permute.xlu0 %3582 }
0x1720   :  { %v3585_v23 = vunpack.i.h.bf16 %v3583_v20  ;;  %v3584_v30 = vunpack.i.l.bf16 %v3583_v20 }
0x1722   :  { %v3447_v31 = vpack.c.bf16 %v3585_v23, %v3584_v30 }
0x1724   :  { %3449 = vmatprep.subr.msk.bf16.mxu1 %vm3998_vm11, %v3447_v31 }
0x1725   :  { %3452 = vmatpush3.bf16.msk.msra.mxu1 %vm3998_vm11, %v3447_v31 }
0x1726   :  { %3455 = vmatprep.subr.msk.bf16.mxu1 %vm3960_vm4, %v3453_v32  ;;  %v3675_v24 = vpop.eup %3674 }
0x1727   :  { %v1956_v39 = vmul.f32 %v3675_v24, %v3667_v4 }
0x1748   :  { %v1949_v29 = vpop.xlane.xlu1 %1948 }
0x1749   :  { %3676 = vrcp.f32 %v1949_v29 }
0x174c   :  { %v2048_v12 = vpop.permute.xlu1 %2047 }
0x1753   :  { %v3677_v37 = vpop.eup %3676 }
0x1754   :  { %v1955_v38 = vmul.f32 %v3677_v37, %v3669_v43 }
0x1756   :  { %3225 = vmatprep.mubr.msk.f32.mxu1 %vm416_vm8, %v1955_v38 }
0x1757   :  { %3226 = vmatmul.mubr.msk.f32.vlgmr.msra.gmra.mrb[20].mxu1 %vm416_vm8, %v1956_v39 }
0x1758   :  { %3458 = vmatpush3.bf16.xpose.msk.msra.mxu1 %vm3960_vm4, %v3453_v32  ;;  %3232 = vmatprep.mubr.msk.f32.mxu1 %vm328_vm3, %v2046_v36 }
0x175f   :  { %3233 = vmatmul.mubr.msk.f32.vlgmr.msra.gmra.mrb[22].mxu1 %vm328_vm3, %v2048_v12 }
0x17f1   :  { %v4312_v14 = vpop.f32.mrb[18].mxu1 }
0x17f2   :  { %v4314_v40 = vpop.f32.mrb[19].mxu1 }
0x182a   :  { %v4316_v41 = vpop.f32.mrb[20].mxu1 }
0x182b   :  { %v4318_v44 = vpop.f32.mrb[21].mxu1 }
0x1832   :  { %v3234_v45 = vpop.f32.mrb[22].mxu1 }
0x1833   :  { %v2137_v48 = vmul.f32 0.35355338, %v3234_v45  ;;  %v2127_v25 = vpop.f32.mrb[23].mxu1 }
0x1834   :  { %v2136_v49 = vmul.f32 0.35355338, %v2127_v25 }
0x1835   :  { %v2139_v50 = vsel %vm193_vm5, %v2137_v48, -1e+30 }
0x1836   :  { %v2143_v27 = vsel %vm420_vm6, %v2139_v50, -inf  ;;  %v2138_v56 = vsel %vm192_vm7, %v2136_v49, -1e+30 }
0x1837   :  { %2144 = vmax.xlane.f32.xlu1 %v2143_v27  ;;  %v2140_v54 = vsel %vm416_vm8, %v2138_v56, -inf }
0x1838   :  { %2141 = vmax.xlane.f32.xlu0 %v2140_v54 }
0x1848   :  { %3597 = vrot.lane.b32.xlu1 %v4248_v42, %s3722_s12 }
0x184c   :  { %2250 = vrot.lane.b32.xlu1 %v4240_v11, %s3721_s0 }
0x1850   :  { %2252 = vrot.lane.b32.xlu1 %v4237_v8, %s3721_s0 }
0x18c4   :  { %v2145_v28 = vpop.xlane.xlu1 %2144 }
0x18c5   :  { %v2147_v53 = vsub.f32 %v2139_v50, %v2145_v28  ;;  %v2142_v55 = vpop.xlane.xlu0 %2141 }
0x18c6   :  { %v2146_v58 = vsub.f32 %v2138_v56, %v2142_v55  ;;  %v2937_v55 = vld [vmem:[%s4484_s6 + $0x20] sm:$0xff] }
0x18c7   :  { %v2150_v59 = vmul.f32 1.442695, %v2147_v53 }
0x18c8   :  { %v2148_v60 = vmul.f32 1.442695, %v2146_v58  ;;  %v3598_v4 = vpop.permute.xlu1 %3597  ;;  %v2938_v58 = vld [vmem:[%s4484_s6 + $0x28] sm:$0xff] }
0x18c9   :  { %3678 = vpow2.f32 %v2150_v59  ;;  %v3600_v6 = vunpack.i.h.bf16 %v3598_v4  ;;  %v3599_v52 = vunpack.i.l.bf16 %v3598_v4  ;;  %v3477_v59 = vpack.c.bf16 %v2938_v58, %v2937_v55  ;;  %v2953_v58 = vld [vmem:[%s4486_s8 + $0x50] sm:$0xff] }
0x18ca   :  { %3680 = vpow2.f32 %v2148_v60  ;;  %v2940_v60 = vld [vmem:[%s4484_s6 + $0x38] sm:$0xff] }
0x18cb   :  { %v3465_v15 = vpack.c.bf16 %v3600_v6, %v3599_v52 }
0x18cc   :  { %v2251_v19 = vpop.permute.xlu1 %2250 }
0x18d0   :  { %v2253_v10 = vpop.permute.xlu1 %2252 }
0x18d3   :  { %v3679_v62 = vpop.eup %3678 }
0x18d4   :  { %v2155_v1 = vsel %vm420_vm6, %v3679_v62, 0.0  ;;  %v3681_v2 = vpop.eup %3680 }
0x18d5   :  { %2156 = vadd.xlane.f32.xlu0 %v2155_v1  ;;  %v2152_v3 = vsel %vm416_vm8, %v3681_v2, 0.0 }
0x18d9   :  { %2153 = vadd.xlane.f32.xlu0 %v2152_v3 }
0x18ef   :  { %3592 = vrot.lane.b32.xlu0 %v4248_v42, %s3720_s11 }
0x1962   :  { %v2157_v8 = vpop.xlane.xlu0 %2156 }
0x1963   :  { %3682 = vrcp.f32 %v2157_v8 }
0x1966   :  { %v2154_v11 = vpop.xlane.xlu0 %2153 }
0x1967   :  { %3684 = vrcp.f32 %v2154_v11 }
0x196a   :  { %v3593_v5 = vpop.permute.xlu0 %3592 }
0x196b   :  { %v3595_v43 = vunpack.i.h.bf16 %v3593_v5  ;;  %v3594_v9 = vunpack.i.l.bf16 %v3593_v5 }
0x196d   :  { %v3459_v51 = vpack.c.bf16 %v3595_v43, %v3594_v9  ;;  %v3683_v16 = vpop.eup %3682 }
0x196e   :  { %v2161_v18 = vmul.f32 %v3683_v16, %v3679_v62  ;;  %v3481_v62 = vpack.c.bf16 %v2940_v60, %v2939_v33  ;;  %v2954_v33 = vld [vmem:[%s4486_s8 + $0x58] sm:$0xff]  ;;  %v2955_v60 = vld [vmem:[%s4486_s8 + $0x60] sm:$0xff] }
0x196f   :  { %3461 = vmatprep.subr.msk.bf16.mxu0 %vm3998_vm11, %v3459_v51 }
0x1970   :  { %3464 = vmatpush3.bf16.msk.msra.mxu0 %vm3998_vm11, %v3459_v51 }
0x1971   :  { %v3685_v17 = vpop.eup %3684  ;;  %3467 = vmatprep.subr.msk.bf16.mxu0 %vm3960_vm4, %v3465_v15 }
0x1972   :  { %v2160_v13 = vmul.f32 %v3685_v17, %v3681_v2 }
0x1974   :  { %3239 = vmatprep.mubr.msk.f32.mxu0 %vm416_vm8, %v2160_v13 }
0x1975   :  { %3240 = vmatmul.mubr.msk.f32.vlgmr.msra.gmra.mrb[16].mxu0 %vm416_vm8, %v2161_v18 }
0x1976   :  { %3246 = vmatprep.mubr.msk.f32.mxu0 %vm328_vm3, %v2251_v19 }
0x1979   :  { %3470 = vmatpush3.bf16.xpose.msk.msra.mxu0 %vm3960_vm4, %v3465_v15 }
0x1980   :  { %3247 = vmatmul.mubr.msk.f32.vlgmr.msra.gmra.mrb[18].mxu0 %vm328_vm3, %v2253_v10 }
0x1a48   :  { %v3241_v20 = vpop.f32.mrb[16].mxu0 }
0x1a49   :  { %v2241_v21 = vpop.f32.mrb[17].mxu0 }
0x1a53   :  { %v3248_v22 = vpop.f32.mrb[18].mxu0 }
0x1a54   :  { %v2342_v23 = vmul.f32 0.35355338, %v3248_v22  ;;  %v2332_v30 = vpop.f32.mrb[19].mxu0 }
0x1a55   :  { %v2341_v31 = vmul.f32 0.35355338, %v2332_v30 }
0x1a56   :  { %v2344_v32 = vsel %vm193_vm5, %v2342_v23, -1e+30 }
0x1a57   :  { %v2348_v36 = vsel %vm420_vm6, %v2344_v32, -inf  ;;  %v2343_v29 = vsel %vm192_vm7, %v2341_v31, -1e+30 }
0x1a58   :  { %2349 = vmax.xlane.f32.xlu1 %v2348_v36  ;;  %v2345_v61 = vsel %vm416_vm8, %v2343_v29, -inf }
0x1a59   :  { %2346 = vmax.xlane.f32.xlu0 %v2345_v61  ;;  %v2943_v61 = vld [vmem:[%s4485_s7 + $0x20] sm:$0xff] }
0x1a69   :  { %2457 = vrot.lane.b32.xlu1 %v4318_v44, %s3724_s14 }
0x1a6d   :  { %2459 = vrot.lane.b32.xlu1 %v4316_v41, %s3724_s14 }
0x1a71   :  { %2465 = vrot.lane.b32.xlu1 %v2241_v21, %s3725_s15 }
0x1ae5   :  { %v2350_v24 = vpop.xlane.xlu1 %2349 }
0x1ae6   :  { %v2352_v63 = vsub.f32 %v2344_v32, %v2350_v24  ;;  %v2347_v37 = vpop.xlane.xlu0 %2346  ;;  %v2944_v24 = vld [vmem:[%s4485_s7 + $0x28] sm:$0xff] }
0x1ae7   :  { %v2351_v38 = vsub.f32 %v2343_v29, %v2347_v37  ;;  %v2945_v37 = vld [vmem:[%s4485_s7 + $0x30] sm:$0xff] }
0x1ae8   :  { %v2355_v39 = vmul.f32 1.442695, %v2352_v63  ;;  %v3485_v63 = vpack.c.bf16 %v2944_v24, %v2943_v61 }
0x1ae9   :  { %v2353_v12 = vmul.f32 1.442695, %v2351_v38  ;;  %v2458_v3 = vpop.permute.xlu1 %2457  ;;  %v2946_v38 = vld [vmem:[%s4485_s7 + $0x38] sm:$0xff] }
0x1aea   :  { %3686 = vpow2.f32 %v2355_v39  ;;  %v2479_v5 = vsel %vm328_vm3, %v4314_v40, %v2458_v3  ;;  %3486 = vmatprep.subr.bf16.mxu0 %v3485_v63  ;;  %v2623_v39 = vrot.slane %v4206_v46, %v1311_v57  ;;  %v2951_v46 = vld [vmem:[%s4486_s8 + $0x40] sm:$0xff]  ;;  %v2958_v3 = vld [vmem:[%s4486_s8 + $0x78] sm:$0xff] }
0x1aeb   :  { %3688 = vpow2.f32 %v2353_v12  ;;  %3488 = vmatpush3.bf16.msra.mxu0 %v3485_v63 }
0x1aed   :  { %v2460_v8 = vpop.permute.xlu1 %2459 }
0x1aee   :  { %v2480_v52 = vsel %vm328_vm3, %v4312_v14, %v2460_v8 }
0x1af1   :  { %v2466_v4 = vpop.permute.xlu1 %2465 }
0x1af2   :  { %v2481_v43 = vsel %vm1170_vm12, %v2479_v5, %v2466_v4 }
0x1af4   :  { %v3687_v0 = vpop.eup %3686 }
0x1af5   :  { %v2360_v45 = vsel %vm420_vm6, %v3687_v0, 0.0  ;;  %v3689_v48 = vpop.eup %3688 }
0x1af6   :  { %2361 = vadd.xlane.f32.xlu0 %v2360_v45  ;;  %v2357_v44 = vsel %vm416_vm8, %v3689_v48, 0.0 }
0x1afa   :  { %2358 = vadd.xlane.f32.xlu0 %v2357_v44 }
0x1b10   :  { %3602 = vrot.lane.b32.xlu0 %v4248_v42, %s3723_s2 }
0x1b14   :  { %2467 = vrot.lane.b32.xlu0 %v3241_v20, %s3725_s15 }
0x1b83   :  { %v2362_v41 = vpop.xlane.xlu0 %2361 }
0x1b84   :  { %3690 = vrcp.f32 %v2362_v41 }
0x1b87   :  { %v2359_v25 = vpop.xlane.xlu0 %2358 }
0x1b88   :  { %3692 = vrcp.f32 %v2359_v25 }
0x1b8b   :  { %v3603_v49 = vpop.permute.xlu0 %3602 }
0x1b8c   :  { %v3605_v50 = vunpack.i.h.bf16 %v3603_v49  ;;  %v3604_v27 = vunpack.i.l.bf16 %v3603_v49 }
0x1b8e   :  { %v3471_v56 = vpack.c.bf16 %v3605_v50, %v3604_v27  ;;  %v3691_v54 = vpop.eup %3690 }
0x1b8f   :  { %v2366_v42 = vmul.f32 %v3691_v54, %v3687_v0  ;;  %v2468_v11 = vpop.permute.xlu0 %2467 }
0x1b90   :  { %3473 = vmatprep.subr.msk.bf16.mxu1 %vm3998_vm11, %v3471_v56  ;;  %v2482_v51 = vsel %vm1170_vm12, %v2480_v52, %v2468_v11 }
0x1b91   :  { %3476 = vmatpush3.bf16.msk.msra.mxu1 %vm3998_vm11, %v3471_v56 }
0x1b92   :  { %v3693_v28 = vpop.eup %3692  ;;  %3478 = vmatprep.subr.bf16.mxu1 %v3477_v59 }
0x1b93   :  { %v2365_v53 = vmul.f32 %v3693_v28, %v3689_v48 }
0x1b95   :  { %3253 = vmatprep.mubr.msk.f32.mxu1 %vm416_vm8, %v2365_v53 }
0x1b96   :  { %3254 = vmatmul.mubr.msk.f32.vlgmr.msra.gmra.mrb[24].mxu1 %vm416_vm8, %v2366_v42  ;;  %v2952_v42 = vld [vmem:[%s4486_s8 + $0x48] sm:$0xff] }
0x1b97   :  { %3480 = vmatpush3.bf16.msra.mxu1 %v3477_v59  ;;  %v3493_v55 = vpack.c.bf16 %v2952_v42, %v2951_v46  ;;  %v3497_v59 = vpack.c.bf16 %v2954_v33, %v2953_v58 }
0x1b98   :  { %3482 = vmatprep.subr.bf16.mxu1 %v3481_v62 }
0x1b9b   :  { %3484 = vmatpush3.bf16.msra.mxu1 %v3481_v62  ;;  %v2956_v62 = vld [vmem:[%s4486_s8 + $0x68] sm:$0xff] }
0x1b9c   :  { %3494 = vmatprep.subr.bf16.mxu1 %v3493_v55 }
0x1c69   :  { %v3255_v1 = vpop.f32.mrb[24].mxu1 }
0x1c6a   :  { %2475 = vrot.lane.b32.xlu0 %v3255_v1, %s3726_s24  ;;  %v2446_v2 = vpop.f32.mrb[25].mxu1  ;;  %v3501_v1 = vpack.c.bf16 %v2956_v62, %v2955_v60 }
0x1c6b   :  { %2473 = vrot.lane.b32.xlu1 %v2446_v2, %s3726_s24  ;;  %v2957_v2 = vld [vmem:[%s4486_s8 + $0x70] sm:$0xff] }
0x1c6c   :  { %v3505_v8 = vpack.c.bf16 %v2958_v3, %v2957_v2 }
0x1c6f   :  { %2574 = vrot.lane.b32.xlu1 %v4234_v7, %s3727_s25 }
0x1cdc   :  { %v2476_v6 = vpop.permute.xlu0 %2475 }
0x1cdd   :  { %v2474_v9 = vpop.permute.xlu1 %2473  ;;  %v2484_v7 = vsel %vm1173_vm13, %v2482_v51, %v2476_v6 }
0x1cde   :  { %v2483_v15 = vsel %vm1173_vm13, %v2481_v43, %v2474_v9 }
0x1cdf   :  { %3264 = vmatprep.mubr.msk.f32.mxu1 %vm148_vm1, %v2483_v15 }
0x1ce0   :  { %3265 = vmatmul.mubr.msk.f32.vlgmr.msra.gmra.mrb[26].mxu1 %vm148_vm1, %v2484_v7 }
0x1ce1   :  { %v2575_v17 = vpop.permute.xlu1 %2574  ;;  %3496 = vmatpush3.bf16.msra.mxu1 %v3493_v55 }
0x1ce2   :  { %3498 = vmatprep.subr.bf16.mxu1 %v3497_v59 }
0x1ce5   :  { %3500 = vmatpush3.bf16.msra.mxu1 %v3497_v59 }
0x1ce6   :  { %3502 = vmatprep.subr.bf16.mxu1 %v3501_v1 }
0x1ce9   :  { %3504 = vmatpush3.bf16.msra.mxu1 %v3501_v1 }
0x1cea   :  { %3506 = vmatprep.subr.bf16.mxu1 %v3505_v8 }
0x1ced   :  { %3508 = vmatpush3.bf16.msra.mxu1 %v3505_v8 }
0x1db3   :  { %v3266_v16 = vpop.f32.mrb[26].mxu1 }
0x1db4   :  { %v2572_v40 = vadd.f32 %v3266_v16, %v4191_v34  ;;  %v2562_v13 = vpop.f32.mrb[27].mxu1 }
0x1db5   :  { %v2571_v14 = vadd.f32 %v2562_v13, %v4193_v35 }
0x1db6   :  { %v4398_v18 = vadd.f32 %v2575_v17, %v2572_v40 }
0x1db7   :  { %v4400_v19 = vadd.f32 %v2575_v17, %v2571_v14 }
0x1db8   :  { %v2582_v10 = vsel %vm152_vm2, %v4398_v18, 0.0 }
0x1db9   :  { %2583 = vadd.xlane.f32.xlu1 %v2582_v10  ;;  %v2579_v20 = vsel %vm148_vm1, %v4400_v19, 0.0 }
0x1dba   :  { %2580 = vadd.xlane.f32.xlu0 %v2579_v20 }
0x1dca   :  { %2610 = vrot.lane.b32.xlu1 %v4211_v47, %s3727_s25 }
0x1dce   :  { %2814 = vrot.lane.b32.xlu1 %v2623_v39, %s3715_s28 }
0x1e46   :  { %v2584_v21 = vpop.xlane.xlu1 %2583 }
0x1e47   :  { %v2586_v34 = vmul.f32 0.03125, %v2584_v21  ;;  %v2581_v22 = vpop.xlane.xlu0 %2580 }
0x1e48   :  { %v2585_v23 = vmul.f32 0.03125, %v2581_v22 }
0x1e49   :  { %v2588_v35 = vsub.f32 %v4398_v18, %v2586_v34 }
0x1e4a   :  { %v2587_v30 = vsub.f32 %v4400_v19, %v2585_v23  ;;  %v2611_v26 = vpop.permute.xlu1 %2610 }
0x1e4b   :  { %v2590_v31 = vmul.f32 %v2588_v35, %v2588_v35 }
0x1e4c   :  { %v2589_v36 = vmul.f32 %v2587_v30, %v2587_v30 }
0x1e4d   :  { %v2594_v32 = vsel %vm152_vm2, %v2590_v31, 0.0 }
0x1e4e   :  { %2595 = vadd.xlane.f32.xlu0 %v2594_v32  ;;  %v2591_v29 = vsel %vm148_vm1, %v2589_v36, 0.0  ;;  %v2815_v21 = vpop.permute.xlu1 %2814  ;;  %v3710_v36 = vld [vmem:[%s4480_s4] ss:$0 sm:$0xff] }
0x1e52   :  { %2592 = vadd.xlane.f32.xlu0 %v2591_v29 }
0x1e68   :  { %2605 = vrot.lane.b32.xlu0 %v4211_v47, %s3715_s28  ;;  %v3489_v47 = vpack.c.bf16 %v2946_v38, %v2945_v37 }
0x1e6a   :  { %3490 = vmatprep.subr.bf16.mxu0 %v3489_v47 }
0x1e6b   :  { %3492 = vmatpush3.bf16.msra.mxu0 %v3489_v47 }
0x1edb   :  { %v2596_v12 = vpop.xlane.xlu0 %2595 }
0x1edc   :  { %v2598_v0 = vmul.f32 0.03125, %v2596_v12 }
0x1ede   :  { %v2600_v45 = vadd.f32 1e-05, %v2598_v0 }
0x1edf   :  { %v2593_v48 = vpop.xlane.xlu0 %2592 }
0x1ee0   :  { %3694 = vrsqrt.f32 %v2600_v45  ;;  %v2597_v44 = vmul.f32 0.03125, %v2593_v48 }
0x1ee2   :  { %v2599_v41 = vadd.f32 1e-05, %v2597_v44 }
0x1ee3   :  { %v2606_v50 = vpop.permute.xlu0 %2605 }
0x1ee4   :  { %3696 = vrsqrt.f32 %v2599_v41 }
0x1eea   :  { %v3695_v25 = vpop.eup %3694 }
0x1eeb   :  { %v2604_v49 = vmul.f32 %v3695_v25, %v2588_v35 }
0x1eed   :  { %v2609_v54 = vmul.f32 %v2606_v50, %v2604_v49 }
0x1eee   :  { %v3697_v27 = vpop.eup %3696 }
0x1eef   :  { %v2603_v56 = vmul.f32 %v3697_v27, %v2587_v30  ;;  %v2614_v57 = vadd.f32 %v2611_v26, %v2609_v54 }
0x1ef1   :  { %v2608_v28 = vmul.f32 %v2606_v50, %v2603_v56 }
0x1ef3   :  { %v2613_v53 = vadd.f32 %v2611_v26, %v2608_v28 }
0x1ef5   :  { %3275 = vmatprep.mubr.msk.f32.mxu0 %vm148_vm1, %v2613_v53 }
0x1ef6   :  { %3276 = vmatmul.mubr.msk.f32.vlgmr.msra.gmra.mrb[20].mxu0 %vm148_vm1, %v2614_v57 }
0x1fc9   :  { %v3277_v11 = vpop.f32.mrb[20].mxu0 }
0x1fca   :  { %v2702_v4 = vadd.f32 %v3277_v11, %v2623_v39  ;;  %v2696_v5 = vpop.f32.mrb[21].mxu0 }
0x1fcb   :  { %v2697_v6 = vadd.f32 %v2696_v5, %v2623_v39 }
0x1fcc   :  { %v2950_v52 = vmul.f32 -1.702, %v2702_v4 }
0x1fcd   :  { %v2949_v43 = vmul.f32 -1.702, %v2697_v6 }
0x1fce   :  { %v2711_v9 = vmul.f32 1.442695, %v2950_v52 }
0x1fcf   :  { %v2709_v51 = vmul.f32 1.442695, %v2949_v43 }
0x1fd0   :  { %3698 = vpow2.f32 %v2711_v9 }
0x1fd1   :  { %3700 = vpow2.f32 %v2709_v51 }
0x1fda   :  { %v3699_v15 = vpop.eup %3698 }
0x1fdb   :  { %v3701_v7 = vpop.eup %3700  ;;  %v2714_v16 = vadd.f32 1.0, %v3699_v15 }
0x1fdc   :  { %v2713_v17 = vadd.f32 1.0, %v3701_v7 }
0x1fdd   :  { %3702 = vrcp.f32 %v2714_v16 }
0x1fde   :  { %3704 = vrcp.f32 %v2713_v17 }
0x1fe7   :  { %v3703_v40 = vpop.eup %3702 }
0x1fe8   :  { %v3705_v13 = vpop.eup %3704  ;;  %v2720_v10 = vmul.f32 %v3703_v40, %v2702_v4 }
0x1fe9   :  { %v2719_v14 = vmul.f32 %v3705_v13, %v2697_v6 }
0x1feb   :  { %3294 = vmatprep.mubr.msk.f32.mxu1 %vm65_vm0, %v2719_v14 }
0x1fec   :  { %3295 = vmatmul.mubr.msk.f32.vlgmr.msra.gmra.mrb[28].mxu1 %vm65_vm0, %v2720_v10 }
0x20bf   :  { %v3296_v20 = vpop.f32.mrb[28].mxu1 }
0x20c0   :  { %v2812_v34 = vadd.f32 %v3296_v20, %v4398_v18  ;;  %v2802_v22 = vpop.f32.mrb[29].mxu1 }
0x20c1   :  { %v2811_v23 = vadd.f32 %v2802_v22, %v4400_v19 }
0x20c2   :  { %v2818_v35 = vadd.f32 %v2815_v21, %v2812_v34 }
0x20c3   :  { %v2817_v30 = vadd.f32 %v2815_v21, %v2811_v23 }
0x20c4   :  { %v2822_v31 = vsel %vm152_vm2, %v2818_v35, 0.0 }
0x20c5   :  { %2823 = vadd.xlane.f32.xlu0 %v2822_v31  ;;  %v2819_v32 = vsel %vm148_vm1, %v2817_v30, 0.0 }
0x20c6   :  { %2820 = vadd.xlane.f32.xlu1 %v2819_v32 }
0x20d7   :  { %2845 = vrot.lane.b32.xlu1 %v3710_v36, %s3715_s28 }
0x2152   :  { %v2824_v29 = vpop.xlane.xlu0 %2823 }
0x2153   :  { %v2826_v61 = vmul.f32 0.03125, %v2824_v29  ;;  %v2821_v18 = vpop.xlane.xlu1 %2820 }
0x2154   :  { %v2825_v24 = vmul.f32 0.03125, %v2821_v18 }
0x2155   :  { %v2828_v63 = vsub.f32 %v2818_v35, %v2826_v61 }
0x2156   :  { %v2827_v19 = vsub.f32 %v2817_v30, %v2825_v24 }
0x2157   :  { %v2830_v47 = vmul.f32 %v2828_v63, %v2828_v63  ;;  %v2846_v49 = vpop.permute.xlu1 %2845 }
0x2158   :  { %v2829_v37 = vmul.f32 %v2827_v19, %v2827_v19 }
0x2159   :  { %v2834_v39 = vsel %vm152_vm2, %v2830_v47, 0.0 }
0x215a   :  { %v2831_v38 = vsel %vm148_vm1, %v2829_v37, 0.0 }
0x215b   :  { %2832 = vadd.xlane.f32.xlu0 %v2831_v38 }
0x215f   :  { %2835 = vadd.xlane.f32.xlu0 %v2834_v39 }
0x2175   :  { %2850 = vrot.lane.b32.xlu0 %v3710_v36, %s3727_s25 }
0x21e8   :  { %v2833_v12 = vpop.xlane.xlu0 %2832 }
0x21e9   :  { %v2837_v0 = vmul.f32 0.03125, %v2833_v12 }
0x21eb   :  { %v2839_v45 = vadd.f32 1e-05, %v2837_v0 }
0x21ec   :  { %v2836_v48 = vpop.xlane.xlu0 %2835 }
0x21ed   :  { %3706 = vrsqrt.f32 %v2839_v45  ;;  %v2838_v44 = vmul.f32 0.03125, %v2836_v48 }
0x21ef   :  { %v2840_v41 = vadd.f32 1e-05, %v2838_v44 }
0x21f0   :  { %v2851_v27 = vpop.permute.xlu0 %2850 }
0x21f1   :  { %3708 = vrsqrt.f32 %v2840_v41 }
0x21f7   :  { %v3707_v25 = vpop.eup %3706 }
0x21f8   :  { %v2843_v50 = vmul.f32 %v3707_v25, %v2827_v19 }
0x21fa   :  { %v2848_v56 = vmul.f32 %v2846_v49, %v2843_v50 }
0x21fb   :  { %v3709_v54 = vpop.eup %3708 }
0x21fc   :  { %v2844_v28 = vmul.f32 %v3709_v54, %v2828_v63  ;;  %v2853_v26 = vadd.f32 %v2851_v27, %v2848_v56 }
0x21fe   :  { %v2849_v53 = vmul.f32 %v2846_v49, %v2844_v28  ;;  %2855 = vst.msk [vmem:[%s4487_s10] sm:$0xff] %vm148_vm1, %v2853_v26 }
0x2200   :  { %v2854_v57 = vadd.f32 %v2851_v27, %v2849_v53 }
0x2202   :  { %2856 = vst.msk [vmem:[%s4487_s10 + $0x8] sm:$0x3] %vm152_vm2, %v2854_v57 }

</bundles_post_ra>
